<compile_context>
chip_gen: v5e
topology: v5e:2x2
jax: 0.10.0
libtpu: 0.0.40
codegen_flags: <defaults>
</compile_context>

<pallas_src>
import jax
import jax.numpy as jnp
from jax.experimental import pallas as pl
from jax.experimental.pallas import tpu as pltpu


# --------------------------------------------------------------------------
# Fused Bottleneck kernel (one image per grid step)
# --------------------------------------------------------------------------
def bottleneck_kernel(x_ref, w1_ref, b1_ref, w2_ref, b2_ref, w3_ref, b3_ref,
                      o_ref, pad_ref):
    # x_ref:   (1, H, W, Cin)   f32      o_ref: (1, H, W, Cout) f32
    # w1_ref:  (Cin, Cmid)      bf16     b1_ref: (1, Cmid) f32
    # w2_ref:  (9, Cmid, Cmid)  bf16     b2_ref: (1, Cmid) f32
    # w3_ref:  (Cmid, Cout)     bf16     b3_ref: (1, Cout) f32
    # pad_ref: (H+2, W+2, Cmid) f32 VMEM scratch (zero-padded conv2 input)
    H = x_ref.shape[1]
    W = x_ref.shape[2]
    Cin = x_ref.shape[3]
    Cmid = w1_ref.shape[1]
    Cout = o_ref.shape[3]

    x2d = x_ref[0].reshape(H * W, Cin)                      # (HW, Cin) f32

    # ---- conv1 (1x1) + bn1 (scale folded into w1) + relu -------------------
    h1 = jnp.dot(x2d.astype(jnp.bfloat16), w1_ref[...],
                 preferred_element_type=jnp.float32)
    h1 = jnp.maximum(h1 + b1_ref[...], 0.0)                 # (HW, Cmid)

    # ---- deposit into zero-padded scratch (implicit padding=1 of conv2) ----
    pad_ref[...] = jnp.zeros_like(pad_ref)
    pad_ref[1:H + 1, 1:W + 1, :] = h1.reshape(H, W, Cmid)

    # ---- conv2 (3x3, stride 1, pad 1) + bn2 + relu: 9 tap matmuls ----------
    acc = jnp.zeros((H * W, Cmid), jnp.float32)
    for ky in range(3):
        for kx in range(3):
            tap = pad_ref[ky:ky + H, kx:kx + W, :].reshape(H * W, Cmid)
            acc = acc + jnp.dot(tap.astype(jnp.bfloat16),
                                w2_ref[3 * ky + kx],
                                preferred_element_type=jnp.float32)
    h2 = jnp.maximum(acc + b2_ref[...], 0.0)                # (HW, Cmid)

    # ---- conv3 (1x1) + bn3 + identity residual + relu ----------------------
    y = jnp.dot(h2.astype(jnp.bfloat16), w3_ref[...],
                preferred_element_type=jnp.float32)
    y = jnp.maximum(y + b3_ref[...] + x2d, 0.0)             # (HW, Cout)
    o_ref[0] = y.reshape(H, W, Cout).astype(o_ref.dtype)


# --------------------------------------------------------------------------
# Wrapper: NCHW <-> NHWC plumbing + pallas_call
# --------------------------------------------------------------------------
def bottleneck_forward(params, x_nchw):
    """x_nchw: (B, Cin, H, W) float32. Returns (B, Cout, H, W) float32."""
    B, Cin, H, W = x_nchw.shape
    Cmid = params["w1"].shape[1]
    Cout = params["w3"].shape[1]
    assert Cin == Cout, "identity residual path requires Cin == expansion*Cmid"

    x = jnp.transpose(x_nchw, (0, 2, 3, 1)).astype(jnp.float32)   # NHWC

    out = pl.pallas_call(
        bottleneck_kernel,
        out_shape=jax.ShapeDtypeStruct((B, H, W, Cout), jnp.float32),
        grid=(B,),
        in_specs=[
            pl.BlockSpec((1, H, W, Cin), lambda b: (b, 0, 0, 0)),
            pl.BlockSpec((Cin, Cmid), lambda b: (0, 0)),
            pl.BlockSpec((1, Cmid), lambda b: (0, 0)),
            pl.BlockSpec((9, Cmid, Cmid), lambda b: (0, 0, 0)),
            pl.BlockSpec((1, Cmid), lambda b: (0, 0)),
            pl.BlockSpec((Cmid, Cout), lambda b: (0, 0)),
            pl.BlockSpec((1, Cout), lambda b: (0, 0)),
        ],
        out_specs=pl.BlockSpec((1, H, W, Cout), lambda b: (b, 0, 0, 0)),
        scratch_shapes=[pltpu.VMEM((H + 2, W + 2, Cmid), jnp.float32)],
        compiler_params=pltpu.CompilerParams(
            dimension_semantics=("parallel",)),
    )(x, params["w1"], params["b1"], params["w2"], params["b2"],
      params["w3"], params["b3"])

    return jnp.transpose(out, (0, 3, 1, 2))                        # NCHW


# --------------------------------------------------------------------------
# Parameter init (PyTorch-layout weights + eval-mode BN stats) and folding
# --------------------------------------------------------------------------
def init_params(key, cin, cmid, expansion=4, eps=1e-5):
    cout = cmid * expansion
    assert cin == cout
    ks = jax.random.split(key, 6)

    # PyTorch layouts: Conv2d weight is (Cout, Cin, kH, kW), bias=False.
    cw1 = 0.05 * jax.random.normal(ks[0], (cmid, cin, 1, 1), jnp.float32)
    cw2 = 0.05 * jax.random.normal(ks[1], (cmid, cmid, 3, 3), jnp.float32)
    cw3 = 0.05 * jax.random.normal(ks[2], (cout, cmid, 1, 1), jnp.float32)

    def bn_params(k, c):
        k1, k2, k3, k4 = jax.random.split(k, 4)
        g = 1.0 + 0.1 * jax.random.normal(k1, (c,), jnp.float32)
        b = 0.1 * jax.random.normal(k2, (c,), jnp.float32)
        m = 0.1 * jax.random.normal(k3, (c,), jnp.float32)
        v = jax.random.uniform(k4, (c,), jnp.float32, minval=0.5, maxval=1.5)
        return g, b, m, v

    g1, be1, m1, v1 = bn_params(ks[3], cmid)
    g2, be2, m2, v2 = bn_params(ks[4], cmid)
    g3, be3, m3, v3 = bn_params(ks[5], cout)

    def fold(g, be, m, v):
        s = g / jnp.sqrt(v + eps)
        return s, be - m * s

    s1, b1 = fold(g1, be1, m1, v1)
    s2, b2 = fold(g2, be2, m2, v2)
    s3, b3 = fold(g3, be3, m3, v3)

    # Matmul-column weights (Cin, Cout_cols) with BN scale folded in, bf16.
    w1 = (cw1[:, :, 0, 0].T * s1[None, :]).astype(jnp.bfloat16)         # (Cin, Cmid)
    w2 = jnp.stack([(cw2[:, :, ky, kx].T * s2[None, :])
                    for ky in range(3) for kx in range(3)]
                   ).astype(jnp.bfloat16)                                # (9, Cmid, Cmid)
    w3 = (cw3[:, :, 0, 0].T * s3[None, :]).astype(jnp.bfloat16)         # (Cmid, Cout)

    kernel_params = {
        "w1": w1, "b1": b1.reshape(1, cmid),
        "w2": w2, "b2": b2.reshape(1, cmid),
        "w3": w3, "b3": b3.reshape(1, cout),
    }
    ref_params = {
        "cw1": cw1, "cw2": cw2, "cw3": cw3,
        "g1": g1, "be1": be1, "m1": m1, "v1": v1,
        "g2": g2, "be2": be2, "m2": m2, "v2": v2,
        "g3": g3, "be3": be3, "m3": m3, "v3": v3,
    }
    return kernel_params, ref_params


# --------------------------------------------------------------------------
# Pure-JAX f32 reference (independent of the kernel's weight transforms)
# --------------------------------------------------------------------------
def reference_forward(p, x, eps=1e-5):
    def bn(h, g, b, m, v):
        inv = g / jnp.sqrt(v + eps)
        return h * inv[None, :, None, None] + (b - m * inv)[None, :, None, None]

    dn = ("NCHW", "OIHW", "NCHW")
    h = jax.lax.conv_general_dilated(x, p["cw1"], (1, 1), "VALID",
                                     dimension_numbers=dn)
    h = jax.nn.relu(bn(h, p["g1"], p["be1"], p["m1"], p["v1"]))
    h = jax.lax.conv_general_dilated(h, p["cw2"], (1, 1), ((1, 1), (1, 1)),
                                     dimension_numbers=dn)
    h = jax.nn.relu(bn(h, p["g2"], p["be2"], p["m2"], p["v2"]))
    h = jax.lax.conv_general_dilated(h, p["cw3"], (1, 1), "VALID",
                                     dimension_numbers=dn)
    h = bn(h, p["g3"], p["be3"], p["m3"], p["v3"])
    return jax.nn.relu(h + x)


# --------------------------------------------------------------------------
if __name__ == "__main__":
    key = jax.random.PRNGKey(0)
    kp, kx = jax.random.split(key)

    # Bottleneck(num_in_planes=128, num_bottleneck_planes=32, stride=1,
    #            downsample=None)  -> expansion*32 == 128 == Cin (identity add)
    B, CIN, H, W = 2, 128, 16, 16
    CMID = 32

    kparams, rparams = init_params(kp, CIN, CMID)
    x = jax.random.normal(kx, (B, CIN, H, W), jnp.float32)

    out = bottleneck_forward(kparams, x)
    out = jax.block_until_ready(out)
    assert out.shape == (B, CIN, H, W), out.shape
    assert bool(jnp.all(jnp.isfinite(out)))
    assert bool(jnp.all(out >= 0.0))                 # post-ReLU

    ref = reference_forward(rparams, x)
    max_err = float(jnp.max(jnp.abs(out - ref)))
    assert max_err < 5e-2, f"max abs err vs f32 reference: {max_err}"

    print("KERNEL_OK")
</pallas_src>

<mosaic_0001>
module attributes {stable_mosaic.version = 11 : i64} {
  func.func @bottleneck_kernel(%arg0: i32, %arg1: memref<1x16x16x128xf32, #tpu.memory_space<vmem>>, %arg2: memref<128x32xbf16, #tpu.memory_space<vmem>>, %arg3: memref<1x32xf32, #tpu.memory_space<vmem>>, %arg4: memref<9x32x32xbf16, #tpu.memory_space<vmem>>, %arg5: memref<1x32xf32, #tpu.memory_space<vmem>>, %arg6: memref<32x128xbf16, #tpu.memory_space<vmem>>, %arg7: memref<1x128xf32, #tpu.memory_space<vmem>>, %arg8: memref<1x16x16x128xf32, #tpu.memory_space<vmem>>, %arg9: memref<18x18x32xf32, #tpu.memory_space<vmem>>) attributes {dimension_semantics = [#tpu.dimension_semantics<parallel>], iteration_bounds = array<i64: 2>, scalar_prefetch = 0 : i64, scratch_operands = 1 : i64, tpu.core_type = #tpu.core_type<tc>, window_params = [{transform_indices = @transform_0, window_bounds = array<i64: 1, 16, 16, 128>}, {pipeline_mode = #tpu.pipeline_mode<synchronous>, transform_indices = @transform_1, window_bounds = array<i64: 128, 32>}, {pipeline_mode = #tpu.pipeline_mode<synchronous>, transform_indices = @transform_2, window_bounds = array<i64: 1, 32>}, {pipeline_mode = #tpu.pipeline_mode<synchronous>, transform_indices = @transform_3, window_bounds = array<i64: 9, 32, 32>}, {pipeline_mode = #tpu.pipeline_mode<synchronous>, transform_indices = @transform_4, window_bounds = array<i64: 1, 32>}, {pipeline_mode = #tpu.pipeline_mode<synchronous>, transform_indices = @transform_5, window_bounds = array<i64: 32, 128>}, {pipeline_mode = #tpu.pipeline_mode<synchronous>, transform_indices = @transform_6, window_bounds = array<i64: 1, 128>}, {transform_indices = @transform_7, window_bounds = array<i64: 1, 16, 16, 128>}]} {
    %c0 = arith.constant 0 : index
    %c0_0 = arith.constant 0 : index
    %c0_1 = arith.constant 0 : index
    %c0_2 = arith.constant 0 : index
    %0 = vector.load %arg1[%c0, %c0_0, %c0_1, %c0_2] : memref<1x16x16x128xf32, #tpu.memory_space<vmem>>, vector<1x16x16x128xf32>
    %1 = vector.shape_cast %0 : vector<1x16x16x128xf32> to vector<16x16x128xf32>
    %2 = vector.shape_cast %1 : vector<16x16x128xf32> to vector<256x128xf32>
    %3 = arith.truncf %2 : vector<256x128xf32> to vector<256x128xbf16>
    %c0_3 = arith.constant 0 : index
    %c0_4 = arith.constant 0 : index
    %4 = vector.load %arg2[%c0_3, %c0_4] : memref<128x32xbf16, #tpu.memory_space<vmem>>, vector<128x32xbf16>
    %cst = arith.constant dense<0.000000e+00> : vector<256x32xf32>
    %5 = tpu.matmul %3, %4, %cst {dimension_numbers = #tpu.dot_dimension_numbers<[1], [0], [0], [1], [0, 0, 1, 1], [], []>} : vector<256x128xbf16>, vector<128x32xbf16>, vector<256x32xf32> -> vector<256x32xf32>
    %c0_5 = arith.constant 0 : index
    %c0_6 = arith.constant 0 : index
    %6 = vector.load %arg3[%c0_5, %c0_6] : memref<1x32xf32, #tpu.memory_space<vmem>>, vector<1x32xf32>
    %7 = vector.broadcast %6 : vector<1x32xf32> to vector<256x32xf32>
    %8 = arith.addf %5, %7 : vector<256x32xf32>
    %cst_7 = arith.constant 0.000000e+00 : f32
    %9 = vector.broadcast %cst_7 : f32 to vector<256x32xf32>
    %10 = arith.maximumf %8, %9 : vector<256x32xf32>
    %cst_8 = arith.constant 0.000000e+00 : f32
    %11 = vector.broadcast %cst_8 : f32 to vector<18x18x32xf32>
    %c0_9 = arith.constant 0 : index
    %c0_10 = arith.constant 0 : index
    %c0_11 = arith.constant 0 : index
    %12 = vector.load %arg9[%c0_9, %c0_10, %c0_11] : memref<18x18x32xf32, #tpu.memory_space<vmem>>, vector<18x18x32xf32>
    tpu.vector_store %arg9[%c0_9, %c0_10, %c0_11], %11 {strides = array<i32>} : memref<18x18x32xf32, #tpu.memory_space<vmem>>, vector<18x18x32xf32>,
    %13 = vector.shape_cast %10 : vector<256x32xf32> to vector<16x16x32xf32>
    %c1 = arith.constant 1 : index
    %c1_12 = arith.constant 1 : index
    %c0_13 = arith.constant 0 : index
    %14 = vector.load %arg9[%c1, %c1_12, %c0_13] : memref<18x18x32xf32, #tpu.memory_space<vmem>>, vector<16x16x32xf32>
    tpu.vector_store %arg9[%c1, %c1_12, %c0_13], %13 {strides = array<i32>} : memref<18x18x32xf32, #tpu.memory_space<vmem>>, vector<16x16x32xf32>,
    %cst_14 = arith.constant 0.000000e+00 : f32
    %15 = vector.broadcast %cst_14 : f32 to vector<256x32xf32>
    %c0_15 = arith.constant 0 : index
    %c0_16 = arith.constant 0 : index
    %c0_17 = arith.constant 0 : index
    %16 = vector.load %arg9[%c0_15, %c0_16, %c0_17] : memref<18x18x32xf32, #tpu.memory_space<vmem>>, vector<16x16x32xf32>
    %17 = vector.shape_cast %16 : vector<16x16x32xf32> to vector<256x32xf32>
    %18 = arith.truncf %17 : vector<256x32xf32> to vector<256x32xbf16>
    %c0_18 = arith.constant 0 : index
    %c0_19 = arith.constant 0 : index
    %c0_20 = arith.constant 0 : index
    %19 = vector.load %arg4[%c0_18, %c0_19, %c0_20] : memref<9x32x32xbf16, #tpu.memory_space<vmem>>, vector<1x32x32xbf16>
    %20 = vector.shape_cast %19 : vector<1x32x32xbf16> to vector<32x32xbf16>
    %cst_21 = arith.constant dense<0.000000e+00> : vector<256x32xf32>
    %21 = tpu.matmul %18, %20, %cst_21 {dimension_numbers = #tpu.dot_dimension_numbers<[1], [0], [0], [1], [0, 0, 1, 1], [], []>} : vector<256x32xbf16>, vector<32x32xbf16>, vector<256x32xf32> -> vector<256x32xf32>
    %22 = arith.addf %15, %21 : vector<256x32xf32>
    %c0_22 = arith.constant 0 : index
    %c1_23 = arith.constant 1 : index
    %c0_24 = arith.constant 0 : index
    %23 = vector.load %arg9[%c0_22, %c1_23, %c0_24] : memref<18x18x32xf32, #tpu.memory_space<vmem>>, vector<16x16x32xf32>
    %24 = vector.shape_cast %23 : vector<16x16x32xf32> to vector<256x32xf32>
    %25 = arith.truncf %24 : vector<256x32xf32> to vector<256x32xbf16>
    %c1_25 = arith.constant 1 : index
    %c0_26 = arith.constant 0 : index
    %c0_27 = arith.constant 0 : index
    %26 = vector.load %arg4[%c1_25, %c0_26, %c0_27] : memref<9x32x32xbf16, #tpu.memory_space<vmem>>, vector<1x32x32xbf16>
    %27 = vector.shape_cast %26 : vector<1x32x32xbf16> to vector<32x32xbf16>
    %cst_28 = arith.constant dense<0.000000e+00> : vector<256x32xf32>
    %28 = tpu.matmul %25, %27, %cst_28 {dimension_numbers = #tpu.dot_dimension_numbers<[1], [0], [0], [1], [0, 0, 1, 1], [], []>} : vector<256x32xbf16>, vector<32x32xbf16>, vector<256x32xf32> -> vector<256x32xf32>
    %29 = arith.addf %22, %28 : vector<256x32xf32>
    %c0_29 = arith.constant 0 : index
    %c2 = arith.constant 2 : index
    %c0_30 = arith.constant 0 : index
    %30 = vector.load %arg9[%c0_29, %c2, %c0_30] : memref<18x18x32xf32, #tpu.memory_space<vmem>>, vector<16x16x32xf32>
    %31 = vector.shape_cast %30 : vector<16x16x32xf32> to vector<256x32xf32>
    %32 = arith.truncf %31 : vector<256x32xf32> to vector<256x32xbf16>
    %c2_31 = arith.constant 2 : index
    %c0_32 = arith.constant 0 : index
    %c0_33 = arith.constant 0 : index
    %33 = vector.load %arg4[%c2_31, %c0_32, %c0_33] : memref<9x32x32xbf16, #tpu.memory_space<vmem>>, vector<1x32x32xbf16>
    %34 = vector.shape_cast %33 : vector<1x32x32xbf16> to vector<32x32xbf16>
    %cst_34 = arith.constant dense<0.000000e+00> : vector<256x32xf32>
    %35 = tpu.matmul %32, %34, %cst_34 {dimension_numbers = #tpu.dot_dimension_numbers<[1], [0], [0], [1], [0, 0, 1, 1], [], []>} : vector<256x32xbf16>, vector<32x32xbf16>, vector<256x32xf32> -> vector<256x32xf32>
    %36 = arith.addf %29, %35 : vector<256x32xf32>
    %c1_35 = arith.constant 1 : index
    %c0_36 = arith.constant 0 : index
    %c0_37 = arith.constant 0 : index
    %37 = vector.load %arg9[%c1_35, %c0_36, %c0_37] : memref<18x18x32xf32, #tpu.memory_space<vmem>>, vector<16x16x32xf32>
    %38 = vector.shape_cast %37 : vector<16x16x32xf32> to vector<256x32xf32>
    %39 = arith.truncf %38 : vector<256x32xf32> to vector<256x32xbf16>
    %c3 = arith.constant 3 : index
    %c0_38 = arith.constant 0 : index
    %c0_39 = arith.constant 0 : index
    %40 = vector.load %arg4[%c3, %c0_38, %c0_39] : memref<9x32x32xbf16, #tpu.memory_space<vmem>>, vector<1x32x32xbf16>
    %41 = vector.shape_cast %40 : vector<1x32x32xbf16> to vector<32x32xbf16>
    %cst_40 = arith.constant dense<0.000000e+00> : vector<256x32xf32>
    %42 = tpu.matmul %39, %41, %cst_40 {dimension_numbers = #tpu.dot_dimension_numbers<[1], [0], [0], [1], [0, 0, 1, 1], [], []>} : vector<256x32xbf16>, vector<32x32xbf16>, vector<256x32xf32> -> vector<256x32xf32>
    %43 = arith.addf %36, %42 : vector<256x32xf32>
    %c1_41 = arith.constant 1 : index
    %c1_42 = arith.constant 1 : index
    %c0_43 = arith.constant 0 : index
    %44 = vector.load %arg9[%c1_41, %c1_42, %c0_43] : memref<18x18x32xf32, #tpu.memory_space<vmem>>, vector<16x16x32xf32>
    %45 = vector.shape_cast %44 : vector<16x16x32xf32> to vector<256x32xf32>
    %46 = arith.truncf %45 : vector<256x32xf32> to vector<256x32xbf16>
    %c4 = arith.constant 4 : index
    %c0_44 = arith.constant 0 : index
    %c0_45 = arith.constant 0 : index
    %47 = vector.load %arg4[%c4, %c0_44, %c0_45] : memref<9x32x32xbf16, #tpu.memory_space<vmem>>, vector<1x32x32xbf16>
    %48 = vector.shape_cast %47 : vector<1x32x32xbf16> to vector<32x32xbf16>
    %cst_46 = arith.constant dense<0.000000e+00> : vector<256x32xf32>
    %49 = tpu.matmul %46, %48, %cst_46 {dimension_numbers = #tpu.dot_dimension_numbers<[1], [0], [0], [1], [0, 0, 1, 1], [], []>} : vector<256x32xbf16>, vector<32x32xbf16>, vector<256x32xf32> -> vector<256x32xf32>
    %50 = arith.addf %43, %49 : vector<256x32xf32>
    %c1_47 = arith.constant 1 : index
    %c2_48 = arith.constant 2 : index
    %c0_49 = arith.constant 0 : index
    %51 = vector.load %arg9[%c1_47, %c2_48, %c0_49] : memref<18x18x32xf32, #tpu.memory_space<vmem>>, vector<16x16x32xf32>
    %52 = vector.shape_cast %51 : vector<16x16x32xf32> to vector<256x32xf32>
    %53 = arith.truncf %52 : vector<256x32xf32> to vector<256x32xbf16>
    %c5 = arith.constant 5 : index
    %c0_50 = arith.constant 0 : index
    %c0_51 = arith.constant 0 : index
    %54 = vector.load %arg4[%c5, %c0_50, %c0_51] : memref<9x32x32xbf16, #tpu.memory_space<vmem>>, vector<1x32x32xbf16>
    %55 = vector.shape_cast %54 : vector<1x32x32xbf16> to vector<32x32xbf16>
    %cst_52 = arith.constant dense<0.000000e+00> : vector<256x32xf32>
    %56 = tpu.matmul %53, %55, %cst_52 {dimension_numbers = #tpu.dot_dimension_numbers<[1], [0], [0], [1], [0, 0, 1, 1], [], []>} : vector<256x32xbf16>, vector<32x32xbf16>, vector<256x32xf32> -> vector<256x32xf32>
    %57 = arith.addf %50, %56 : vector<256x32xf32>
    %c2_53 = arith.constant 2 : index
    %c0_54 = arith.constant 0 : index
    %c0_55 = arith.constant 0 : index
    %58 = vector.load %arg9[%c2_53, %c0_54, %c0_55] : memref<18x18x32xf32, #tpu.memory_space<vmem>>, vector<16x16x32xf32>
    %59 = vector.shape_cast %58 : vector<16x16x32xf32> to vector<256x32xf32>
    %60 = arith.truncf %59 : vector<256x32xf32> to vector<256x32xbf16>
    %c6 = arith.constant 6 : index
    %c0_56 = arith.constant 0 : index
    %c0_57 = arith.constant 0 : index
    %61 = vector.load %arg4[%c6, %c0_56, %c0_57] : memref<9x32x32xbf16, #tpu.memory_space<vmem>>, vector<1x32x32xbf16>
    %62 = vector.shape_cast %61 : vector<1x32x32xbf16> to vector<32x32xbf16>
    %cst_58 = arith.constant dense<0.000000e+00> : vector<256x32xf32>
    %63 = tpu.matmul %60, %62, %cst_58 {dimension_numbers = #tpu.dot_dimension_numbers<[1], [0], [0], [1], [0, 0, 1, 1], [], []>} : vector<256x32xbf16>, vector<32x32xbf16>, vector<256x32xf32> -> vector<256x32xf32>
    %64 = arith.addf %57, %63 : vector<256x32xf32>
    %c2_59 = arith.constant 2 : index
    %c1_60 = arith.constant 1 : index
    %c0_61 = arith.constant 0 : index
    %65 = vector.load %arg9[%c2_59, %c1_60, %c0_61] : memref<18x18x32xf32, #tpu.memory_space<vmem>>, vector<16x16x32xf32>
    %66 = vector.shape_cast %65 : vector<16x16x32xf32> to vector<256x32xf32>
    %67 = arith.truncf %66 : vector<256x32xf32> to vector<256x32xbf16>
    %c7 = arith.constant 7 : index
    %c0_62 = arith.constant 0 : index
    %c0_63 = arith.constant 0 : index
    %68 = vector.load %arg4[%c7, %c0_62, %c0_63] : memref<9x32x32xbf16, #tpu.memory_space<vmem>>, vector<1x32x32xbf16>
    %69 = vector.shape_cast %68 : vector<1x32x32xbf16> to vector<32x32xbf16>
    %cst_64 = arith.constant dense<0.000000e+00> : vector<256x32xf32>
    %70 = tpu.matmul %67, %69, %cst_64 {dimension_numbers = #tpu.dot_dimension_numbers<[1], [0], [0], [1], [0, 0, 1, 1], [], []>} : vector<256x32xbf16>, vector<32x32xbf16>, vector<256x32xf32> -> vector<256x32xf32>
    %71 = arith.addf %64, %70 : vector<256x32xf32>
    %c2_65 = arith.constant 2 : index
    %c2_66 = arith.constant 2 : index
    %c0_67 = arith.constant 0 : index
    %72 = vector.load %arg9[%c2_65, %c2_66, %c0_67] : memref<18x18x32xf32, #tpu.memory_space<vmem>>, vector<16x16x32xf32>
    %73 = vector.shape_cast %72 : vector<16x16x32xf32> to vector<256x32xf32>
    %74 = arith.truncf %73 : vector<256x32xf32> to vector<256x32xbf16>
    %c8 = arith.constant 8 : index
    %c0_68 = arith.constant 0 : index
    %c0_69 = arith.constant 0 : index
    %75 = vector.load %arg4[%c8, %c0_68, %c0_69] : memref<9x32x32xbf16, #tpu.memory_space<vmem>>, vector<1x32x32xbf16>
    %76 = vector.shape_cast %75 : vector<1x32x32xbf16> to vector<32x32xbf16>
    %cst_70 = arith.constant dense<0.000000e+00> : vector<256x32xf32>
    %77 = tpu.matmul %74, %76, %cst_70 {dimension_numbers = #tpu.dot_dimension_numbers<[1], [0], [0], [1], [0, 0, 1, 1], [], []>} : vector<256x32xbf16>, vector<32x32xbf16>, vector<256x32xf32> -> vector<256x32xf32>
    %78 = arith.addf %71, %77 : vector<256x32xf32>
    %c0_71 = arith.constant 0 : index
    %c0_72 = arith.constant 0 : index
    %79 = vector.load %arg5[%c0_71, %c0_72] : memref<1x32xf32, #tpu.memory_space<vmem>>, vector<1x32xf32>
    %80 = vector.broadcast %79 : vector<1x32xf32> to vector<256x32xf32>
    %81 = arith.addf %78, %80 : vector<256x32xf32>
    %cst_73 = arith.constant 0.000000e+00 : f32
    %82 = vector.broadcast %cst_73 : f32 to vector<256x32xf32>
    %83 = arith.maximumf %81, %82 : vector<256x32xf32>
    %84 = arith.truncf %83 : vector<256x32xf32> to vector<256x32xbf16>
    %c0_74 = arith.constant 0 : index
    %c0_75 = arith.constant 0 : index
    %85 = vector.load %arg6[%c0_74, %c0_75] : memref<32x128xbf16, #tpu.memory_space<vmem>>, vector<32x128xbf16>
    %cst_76 = arith.constant dense<0.000000e+00> : vector<256x128xf32>
    %86 = tpu.matmul %84, %85, %cst_76 {dimension_numbers = #tpu.dot_dimension_numbers<[1], [0], [0], [1], [0, 0, 1, 1], [], []>} : vector<256x32xbf16>, vector<32x128xbf16>, vector<256x128xf32> -> vector<256x128xf32>
    %c0_77 = arith.constant 0 : index
    %c0_78 = arith.constant 0 : index
    %87 = vector.load %arg7[%c0_77, %c0_78] : memref<1x128xf32, #tpu.memory_space<vmem>>, vector<1x128xf32>
    %88 = vector.broadcast %87 : vector<1x128xf32> to vector<256x128xf32>
    %89 = arith.addf %86, %88 : vector<256x128xf32>
    %90 = arith.addf %89, %2 : vector<256x128xf32>
    %cst_79 = arith.constant 0.000000e+00 : f32
    %91 = vector.broadcast %cst_79 : f32 to vector<256x128xf32>
    %92 = arith.maximumf %90, %91 : vector<256x128xf32>
    %93 = vector.shape_cast %92 : vector<256x128xf32> to vector<16x16x128xf32>
    %c0_80 = arith.constant 0 : index
    %c0_81 = arith.constant 0 : index
    %c0_82 = arith.constant 0 : index
    %c0_83 = arith.constant 0 : index
    %94 = vector.load %arg8[%c0_80, %c0_81, %c0_82, %c0_83] : memref<1x16x16x128xf32, #tpu.memory_space<vmem>>, vector<1x16x16x128xf32>
    %95 = vector.shape_cast %94 : vector<1x16x16x128xf32> to vector<16x16x128xf32>
    %96 = vector.shape_cast %93 : vector<16x16x128xf32> to vector<1x16x16x128xf32>
    tpu.vector_store %arg8[%c0_80, %c0_81, %c0_82, %c0_83], %96 {strides = array<i32>} : memref<1x16x16x128xf32, #tpu.memory_space<vmem>>, vector<1x16x16x128xf32>,
    return
  }
  func.func @transform_0(%arg0: i32) -> (i32, i32, i32, i32) {
    %c0_i32 = arith.constant 0 : i32
    %c0_i32_0 = arith.constant 0 : i32
    %c0_i32_1 = arith.constant 0 : i32
    %c0_i32_2 = arith.constant 0 : i32
    return %arg0, %c0_i32, %c0_i32_0, %c0_i32_1 : i32, i32, i32, i32
  }
  func.func @transform_1(%arg0: i32) -> (i32, i32) {
    %c0_i32 = arith.constant 0 : i32
    %c0_i32_0 = arith.constant 0 : i32
    %c0_i32_1 = arith.constant 0 : i32
    return %c0_i32, %c0_i32_0 : i32, i32
  }
  func.func @transform_2(%arg0: i32) -> (i32, i32) {
    %c0_i32 = arith.constant 0 : i32
    %c0_i32_0 = arith.constant 0 : i32
    %c0_i32_1 = arith.constant 0 : i32
    return %c0_i32, %c0_i32_0 : i32, i32
  }
  func.func @transform_3(%arg0: i32) -> (i32, i32, i32) {
    %c0_i32 = arith.constant 0 : i32
    %c0_i32_0 = arith.constant 0 : i32
    %c0_i32_1 = arith.constant 0 : i32
    %c0_i32_2 = arith.constant 0 : i32
    return %c0_i32, %c0_i32_0, %c0_i32_1 : i32, i32, i32
  }
  func.func @transform_4(%arg0: i32) -> (i32, i32) {
    %c0_i32 = arith.constant 0 : i32
    %c0_i32_0 = arith.constant 0 : i32
    %c0_i32_1 = arith.constant 0 : i32
    return %c0_i32, %c0_i32_0 : i32, i32
  }
  func.func @transform_5(%arg0: i32) -> (i32, i32) {
    %c0_i32 = arith.constant 0 : i32
    %c0_i32_0 = arith.constant 0 : i32
    %c0_i32_1 = arith.constant 0 : i32
    return %c0_i32, %c0_i32_0 : i32, i32
  }
  func.func @transform_6(%arg0: i32) -> (i32, i32) {
    %c0_i32 = arith.constant 0 : i32
    %c0_i32_0 = arith.constant 0 : i32
    %c0_i32_1 = arith.constant 0 : i32
    return %c0_i32, %c0_i32_0 : i32, i32
  }
  func.func @transform_7(%arg0: i32) -> (i32, i32, i32, i32) {
    %c0_i32 = arith.constant 0 : i32
    %c0_i32_0 = arith.constant 0 : i32
    %c0_i32_1 = arith.constant 0 : i32
    %c0_i32_2 = arith.constant 0 : i32
    return %arg0, %c0_i32, %c0_i32_0, %c0_i32_1 : i32, i32, i32, i32
  }
}

</mosaic_0001>

<bundles_post_ra>
// kernel: tpu_custom_call.1
= control target key start
LH: loop header
LB: loop body
LE: loop exit
PB: predicated region body
PF: predicated region fallthrough
CT: control target
= control target key end

     0   :  { %s4840_s0 = inlined_call_operand.hbm [shape: f32[2,16,16,128], index: 0, kind: input, shape index: {}]   ;;  %s4841_s1 = inlined_call_operand.vmem [shape: bf16[128,32], index: 1, kind: input, shape index: {}]   ;;  %s4842_s2 = inlined_call_operand.vmem [shape: f32[1,32], index: 2, kind: input, shape index: {}]   ;;  %s4843_s3 = inlined_call_operand.hbm [shape: bf16[9,32,32], index: 3, kind: input, shape index: {}]   ;;  %s4844_s4 = inlined_call_operand.vmem [shape: f32[1,32], index: 4, kind: input, shape index: {}]   ;;  %s4845_s5 = inlined_call_operand.vmem [shape: bf16[32,128], index: 5, kind: input, shape index: {}]   ;;  %s4846_s6 = inlined_call_operand.vmem [shape: f32[1,128], index: 6, kind: input, shape index: {}]   ;;  %s4847_s7 = inlined_call_operand.hbm [shape: f32[2,16,16,128], index: 7, kind: output, shape index: {}]  }
   0x1   :  { %4851 = sst [smem:[#allocation19_spill]] %s4843_s3 }
   0x2   :  { %12 = vsyncpa [#allocation4], 0 }
   0x3   :  { %14 = vsyncpa [#allocation4 + $0x1], 0 }
   0x4   :  { %15 = vsyncpa [#allocation7], 0 }
   0x5   :  { %16 = vsyncpa [#allocation5], 0 }
   0x6   :  { %18 = vsyncpa [#allocation5 + $0x1], 0  ;;  %s3724_s24 = smov 0   ;;  %s3726_s25 = smov 0  }
   0x7   :  { %s3728_s26 = smov 0   ;;  %s3730_s27 = smov 0  }
   0x8 LB: > { %s3745_s28 = sadd.s32 4294967295, %s3674_s27   ;;  %s3121_s29 = sadd.s32 4294967294, %s3674_s27   ;;  %s3674_s27 = sphi %s3730_s27, %s4876_s27   ;;  %s3670_s26 = sphi %s3728_s26, %s4875_s26   ;;  %s3666_s25 = sphi %s3726_s25, %s4874_s25   ;;  %s3662_s24 = sphi %s3724_s24, %s4873_s24  }
   0x9   : > { %p44_p0 = scmp.ne.s32.totalorder %s3666_s25, %s3662_s24  ;;  %p45_p1 = scmp.eq.s32.totalorder %s3745_s28, 0 }
   0xa   : > { %p194_p2 = scmp.eq.s32.totalorder %s3745_s28, 1  ;;  %p200_p3 = scmp.eq.s32.totalorder %s3121_s29, 1 }
   0xb   : > { %p3754_p4 = por %p45_p1, %p44_p0  ;;  %p3122_p5 = scmp.ge.s32.totalorder %s3674_s27, 1 }
   0xc   : > { %p3759_p6 = por %p200_p3, %p44_p0  ;;  %p207_p7 = scmp.lt.s32.totalorder %s3674_s27, 3 }
   0xd   : > { %s4854_s3 = sld [smem:[#allocation19_spill]]  ;;  %s3676_s13 = smov [#allocation6]  }
   0xe   : > { %p3767_p8 = pnand %p3122_p5, %p207_p7  ;;  %s226_s14 = sshll.u32 %s3676_s13, 4  ;;  %s227_s14 = int_to_ptr.vmem [resolvable:$true] %s226_s14 }
   0xf   : > { %s3777_s15 = sadd.s32 1, %s3674_s27   ;;  %s3677_s16 = smov 64  }
  0x10   : > { %p3453_p9 = pneg %p3767_p8  ;;  %s3678_s17 = smov 4  }
  0x11   : > { %s28_s18 = ssub.s32 %s3674_s27, %s3777_s15  ;;  %s31_s19 = sadd.s32 1, %s3670_s26 }
  0x12   : > { %p3454_p10 = pnand %p3453_p9, %p45_p1  ;;  %p29_p12 = scmp.eq.s32.totalorder %s28_s18, 0 }
  0x13   : > { %s224_s11 = sshll.u32 %s4854_s3, 4  ;;  %p38_p13 = scmp.ne.s32.totalorder %s3670_s26, %s3666_s25  ;;  %s225_s11 = int_to_ptr.hbm [resolvable:$true] %s224_s11 }
  0x14   : > { %3456 = dma.hbm_to_vmem [thread:$0]  (!%p3454_p10), %s225_s11, 2304, %s227_s14, [#allocation7], %s3677_s16, %s3677_s16, %s3678_s17  }
  0x15   : > { %p39_p0 = scmp.eq.s32.totalorder %s3674_s27, 0  ;;  %p3466_p3 = scmp.lt.s32.totalorder %s3674_s27, 2 }
  0x16   : > { %s3787_s20 = scalar_select %p29_p12, %s3670_s26, %s31_s19  }
  0x17   : > { %p40_p5 = por %p39_p0, %p38_p13  ;;  %p3791_p7 = por %p194_p2, %p38_p13 }
  0x18   : > { %s249_s22 = sand.u32 1, %s3670_s26   ;;  %s3409_s23 = sshll.u32 %s3674_s27, 8 }
  0x19   : > { %s3125_s29 = sshll.u32 %s249_s22, 8  ;;  %s258_s11 = scalar_lea.hbm %s4840_s0, %s3409_s23 }
  0x1a   : > { %s259_s13 = sshll.u32 %s258_s11, 4  ;;  %s253_s14 = scalar_lea.vmem [#allocation3], %s3125_s29  ;;  %s260_s13 = int_to_ptr.hbm [resolvable:$true] %s259_s13 }
  0x1b   : > { %s261_s16 = sshll.u32 %s253_s14, 4  ;;  %p3802_p9 = pnand %p3466_p3, %p40_p5  ;;  %s262_s16 = int_to_ptr.vmem [resolvable:$true] %s261_s16 }
  0x1c   : > { %s250_s18 = scalar_lea.sflag [#allocation4], %s249_s22  ;;  %s3574_s19 = sshra.s32 %s260_s13, 4  ;;  %s3575_s19 = int_to_ptr.hbm [resolvable:$true] %s3574_s19 }
  0x1d   : > { %s3576_s3 = scalar_lea.hbm %s3575_s19, 256  ;;  %p3578_p10 = pneg %p3802_p9 }
  0x1e   : > { %p3577_p2 = scmp.ne.s32.totalorder %s3575_s19, %s3576_s3  ;;  %s3581_s9 = scalar_lea.hbm %s4840_s0, 512 }
  0x1f   : > { %p3582_p0 = scmp.lt.s32.totalorder %s3575_s19, %s4840_s0  ;;  %p3583_p3 = scmp.lt.s32.totalorder %s3581_s9, %s3576_s3 }
  0x20   : > { %p3579_p12 = pnand %p3578_p10, %p3577_p2 }
  0x21   : > { %p3584_p5 = por %p3583_p3, %p3582_p0 }
  0x22   : > { %p3580_p13 = pneg %p3579_p12 }
  0x24   : > { %p3585_p11 = pnand %p3584_p5, %p3580_p13 }
  0x26   : > { %3588 = shalt.err (!%p3585_p11)
}
  0x27   : > { %s3679_s22 = smov 128   ;;  %s3680_s14 = smov 8  }
  0x28   : > { %3460 = dma.hbm_to_vmem [thread:$0]  (!%p3802_p9), %s260_s13, 4096, %s262_s16, %s250_s18, %s3679_s22, %s3679_s22, %s3680_s14  }
  0x29   : > { %273 = sbr.rel (%p3767_p8) target bundleno = 1267 (0x4f3), region = 48 }
  0x2e   : > { %s3819_s23 = sand.u32 1, %s3666_s25  }
  0x2f   : > { %s3129_s19 = sshll.u32 %s3819_s23, 8  ;;  %s276_s3 = scalar_lea.sflag [#allocation4], %s3819_s23 }
  0x30   : > { %s3825_s29 = scalar_lea.vmem [#allocation3], %s3129_s19 }
  0x31   : > { %3649 = dma.done.wait (%p3754_p4), %s276_s3, 4096  }
  0x32   : > { %3651 = vsyncadd (%p3754_p4), %s276_s3, 4294963200 }
  0x33   : > { %3653 = dma.done.wait (%p45_p1), [#allocation7], 2304  }
  0x34   : > { %3655 = vsyncadd (%p45_p1), [#allocation7], 4294964992  ;;  %v3417_v0 = vld [vmem:[%s4841_s1 + $0x38] sm:$0xff]  ;;  %v3416_v1 = vld [vmem:[%s4841_s1 + $0x30] sm:$0xff]  ;;  %vm554_vm0 = vcmask 261120   ;;  %v3681_v29 = vmov 0.0  }
  0x35   : > { %433 = vmatpush.bf16.msra.mxu0 %v3417_v0  ;;  %v3415_v2 = vld [vmem:[%s4841_s1 + $0x28] sm:$0xff]  ;;  %v3414_v3 = vld [vmem:[%s4841_s1 + $0x20] sm:$0xff]  ;;  %v3413_v4 = vld [vmem:[%s4841_s1 + $0x18] sm:$0xff]  ;;  %559 = vst.msk [vmem:[#allocation2 + $0x18] sm:$0xff] %vm554_vm0, %v3681_v29  ;;  %vm557_vm1 = vcmask 254976   ;;  %s4672_s16 = scalar_lea.vmem [#allocation8], %s3129_s19 }
  0x36   : > { %v3412_v5 = vld [vmem:[%s4841_s1 + $0x10] sm:$0xff]  ;;  %v3411_v6 = vld [vmem:[%s4841_s1 + $0x8] sm:$0xff]  ;;  %v3410_v7 = vld [vmem:[%s4841_s1] sm:$0xff]  ;;  %560 = vst.msk [vmem:[#allocation2 + $0x20] sm:$0xff] %vm554_vm0, %v3681_v29  ;;  %s3438_s19 = sshll.u32 %s3745_s28, 8  ;;  %s3035_s9 = sshll.u32 %s4672_s16, 4  ;;  %s3036_s9 = int_to_ptr.vmem [resolvable:$true] %s3035_s9 }
  0x37   : > { %v317_v8 = vld [vmem:[%s3825_s29] sm:$0xff]  ;;  %v318_v9 = vld [vmem:[%s3825_s29 + $0x8] sm:$0xff]  ;;  %v319_v11 = vld [vmem:[%s3825_s29 + $0x10] sm:$0xff]  ;;  %555 = vst.msk [vmem:[#allocation2] sm:$0xff] %vm554_vm0, %v3681_v29  ;;  %s3034_s18 = scalar_lea.hbm %s4847_s7, %s3438_s19  ;;  %s3023_s11 = scalar_lea.sflag [#allocation5], %s3819_s23 }
  0x38   : > { %v349_v10 = vpack.c.bf16 %v318_v9, %v317_v8  ;;  %v320_v12 = vld [vmem:[%s3825_s29 + $0x18] sm:$0xff]  ;;  %v321_v14 = vld [vmem:[%s3825_s29 + $0x20] sm:$0xff]  ;;  %v322_v15 = vld [vmem:[%s3825_s29 + $0x28] sm:$0xff]  ;;  %556 = vst.msk [vmem:[#allocation2 + $0x8] sm:$0xff] %vm554_vm0, %v3681_v29  ;;  %s3037_s10 = sshll.u32 %s3034_s18, 4  ;;  %s3624_s12 = scalar_lea.hbm %s4847_s7, 512  ;;  %s3038_s10 = int_to_ptr.hbm [resolvable:$true] %s3037_s10 }
  0x39   : > { %434 = vmatpush.bf16.msra.mxu0 %v3416_v1  ;;  %v350_v13 = vpack.c.bf16 %v320_v12, %v319_v11  ;;  %v351_v16 = vpack.c.bf16 %v322_v15, %v321_v14  ;;  %v323_v17 = vld [vmem:[%s3825_s29 + $0x30] sm:$0xff]  ;;  %v324_v18 = vld [vmem:[%s3825_s29 + $0x38] sm:$0xff]  ;;  %v325_v20 = vld [vmem:[%s3825_s29 + $0x40] sm:$0xff]  ;;  %562 = vst.msk [vmem:[#allocation2 + $0x30] sm:$0xff] %vm554_vm0, %v3681_v29  ;;  %s3618_s28 = sshra.s32 %s3038_s10, 4  ;;  %s3619_s28 = int_to_ptr.hbm [resolvable:$true] %s3618_s28 }
  0x3a   : > { %v352_v19 = vpack.c.bf16 %v324_v18, %v323_v17  ;;  %v326_v21 = vld [vmem:[%s3825_s29 + $0x48] sm:$0xff]  ;;  %v327_v23 = vld [vmem:[%s3825_s29 + $0x50] sm:$0xff]  ;;  %v328_v24 = vld [vmem:[%s3825_s29 + $0x58] sm:$0xff]  ;;  %563 = vst.msk [vmem:[#allocation2 + $0x38] sm:$0xff] %vm554_vm0, %v3681_v29  ;;  %s3620_s22 = scalar_lea.hbm %s3619_s28, 256  ;;  %p3625_p11 = scmp.lt.s32.totalorder %s3619_s28, %s4847_s7 }
  0x3b   : > { %v353_v22 = vpack.c.bf16 %v326_v21, %v325_v20  ;;  %v354_v25 = vpack.c.bf16 %v328_v24, %v327_v23  ;;  %v329_v26 = vld [vmem:[%s3825_s29 + $0x60] sm:$0xff]  ;;  %v330_v27 = vld [vmem:[%s3825_s29 + $0x68] sm:$0xff]  ;;  %565 = vst.msk [vmem:[#allocation2 + $0x48] sm:$0xff] %vm554_vm0, %v3681_v29  ;;  %v331_v30 = vld [vmem:[%s3825_s29 + $0x70] sm:$0xff]  ;;  %p3621_p1 = scmp.ne.s32.totalorder %s3619_s28, %s3620_s22  ;;  %p3626_p9 = scmp.lt.s32.totalorder %s3624_s12, %s3620_s22 }
  0x3c   : > { %v355_v28 = vpack.c.bf16 %v330_v27, %v329_v26  ;;  %566 = vst.msk [vmem:[#allocation2 + $0x50] sm:$0xff] %vm554_vm0, %v3681_v29  ;;  %v332_v31 = vld [vmem:[%s3825_s29 + $0x78] sm:$0xff]  ;;  %v333_v33 = vld [vmem:[%s3825_s29 + $0x80] sm:$0xff]  ;;  %v334_v34 = vld [vmem:[%s3825_s29 + $0x88] sm:$0xff] }
  0x3d   : > { %435 = vmatpush.bf16.msra.mxu0 %v3415_v2  ;;  %568 = vst.msk [vmem:[#allocation2 + $0x60] sm:$0xff] %vm554_vm0, %v3681_v29  ;;  %v356_v32 = vpack.c.bf16 %v332_v31, %v331_v30  ;;  %v3930_v35 = vld [vmem:[%s4842_s2] ss:$0 sm:$0xff]  ;;  %v357_v36 = vpack.c.bf16 %v334_v34, %v333_v33  ;;  %v336_v44 = vld [vmem:[%s3825_s29 + $0x98] sm:$0xff]  ;;  %v3419_v49 = vld [vmem:[#allocation6 + $0x8] sm:$0xff]  ;;  %p3622_p4 = pnand %p3621_p1, %p3791_p7  ;;  %p3627_p2 = por %p3626_p9, %p3625_p11 }
  0x3e   : > { %569 = vst.msk [vmem:[#allocation2 + $0x68] sm:$0xff] %vm554_vm0, %v3681_v29  ;;  %v335_v43 = vld [vmem:[%s3825_s29 + $0x90] sm:$0xff]  ;;  %v3421_v48 = vld [vmem:[#allocation6 + $0x18] sm:$0xff]  ;;  %v3985_v50 = vld [vmem:[#allocation6 + $0x28] sm:$0xff]  ;;  %3441 = vmatpush.bf16.msra.mxu2 %v3419_v49 }
  0x3f   : > { %571 = vst.msk [vmem:[#allocation2 + $0x78] sm:$0xff] %vm554_vm0, %v3681_v29  ;;  %v358_v45 = vpack.c.bf16 %v336_v44, %v335_v43  ;;  %3439 = vmatpush.bf16.msra.mxu1 %v3421_v48  ;;  %v3420_v51 = vld [vmem:[#allocation6 + $0x10] sm:$0xff]  ;;  %v3418_v52 = vld [vmem:[#allocation6] sm:$0xff]  ;;  %3443 = vmatpush.bf16.msra.mxu3 %v3985_v50  ;;  %v3427_v56 = vld [vmem:[#allocation6 + $0x48] sm:$0xff]  ;;  %p3623_p8 = pneg %p3622_p4 }
  0x40   : > { %572 = vst.msk [vmem:[#allocation2 + $0x80] sm:$0xff] %vm554_vm0, %v3681_v29  ;;  %v3994_v55 = vld [vmem:[#allocation6 + $0x20] sm:$0xff]  ;;  %v338_v60 = vld [vmem:[%s3825_s29 + $0xa8] sm:$0xff]  ;;  %v3425_v61 = vld [vmem:[#allocation6 + $0x38] sm:$0xff] }
  0x41   : > { %436 = vmatpush.bf16.msra.mxu0 %v3414_v3  ;;  %574 = vst.msk [vmem:[#allocation2 + $0x90] sm:$0xff] %vm554_vm0, %v3681_v29  ;;  %v337_v59 = vld [vmem:[%s3825_s29 + $0xa0] sm:$0xff]  ;;  %v342_v24 = vld [vmem:[%s3825_s29 + $0xc8] sm:$0xff]  ;;  %v344_v43 = vld [vmem:[%s3825_s29 + $0xd8] sm:$0xff]  ;;  %p3628_p10 = pnand %p3627_p2, %p3623_p8 }
  0x42   : > { %575 = vst.msk [vmem:[#allocation2 + $0x98] sm:$0xff] %vm554_vm0, %v3681_v29  ;;  %3442 = vmatpush.bf16.msra.mxu2 %v3418_v52  ;;  %v359_v62 = vpack.c.bf16 %v338_v60, %v337_v59  ;;  %v341_v23 = vld [vmem:[%s3825_s29 + $0xc0] sm:$0xff] }
  0x43   : > { %577 = vst.msk [vmem:[#allocation2 + $0xa8] sm:$0xff] %vm554_vm0, %v3681_v29  ;;  %3440 = vmatpush.bf16.msra.mxu1 %v3420_v51  ;;  %3444 = vmatpush.bf16.msra.mxu3 %v3994_v55 }
  0x44   : > { %578 = vst.msk [vmem:[#allocation2 + $0xb0] sm:$0xff] %vm554_vm0, %v3681_v29 }
  0x45   : > { %437 = vmatpush.bf16.msra.mxu0 %v3413_v4  ;;  %580 = vst.msk [vmem:[#allocation2 + $0xc0] sm:$0xff] %vm554_vm0, %v3681_v29 }
  0x46   : > { %581 = vst.msk [vmem:[#allocation2 + $0xc8] sm:$0xff] %vm554_vm0, %v3681_v29  ;;  %1633 = vmatpush.bf16.msrb.mxu2 %v3427_v56 }
  0x47   : > { %583 = vst.msk [vmem:[#allocation2 + $0xd8] sm:$0xff] %vm554_vm0, %v3681_v29  ;;  %1399 = vmatpush.bf16.msrb.mxu1 %v3425_v61 }
  0x48   : > { %584 = vst.msk [vmem:[#allocation2 + $0xe0] sm:$0xff] %vm554_vm0, %v3681_v29 }
  0x49   : > { %438 = vmatpush.bf16.msra.mxu0 %v3412_v5  ;;  %586 = vst.msk [vmem:[#allocation2 + $0xf0] sm:$0xff] %vm554_vm0, %v3681_v29  ;;  %v339_v5 = vld [vmem:[%s3825_s29 + $0xb0] sm:$0xff] }
  0x4a   : > { %587 = vst.msk [vmem:[#allocation2 + $0xf8] sm:$0xff] %vm554_vm0, %v3681_v29 }
  0x4b   : > { %589 = vst.msk [vmem:[#allocation2 + $0x108] sm:$0xff] %vm554_vm0, %v3681_v29 }
  0x4c   : > { %590 = vst.msk [vmem:[#allocation2 + $0x110] sm:$0xff] %vm554_vm0, %v3681_v29 }
  0x4d   : > { %439 = vmatpush.bf16.msra.mxu0 %v3411_v6  ;;  %592 = vst.msk [vmem:[#allocation2 + $0x120] sm:$0xff] %vm554_vm0, %v3681_v29  ;;  %v340_v6 = vld [vmem:[%s3825_s29 + $0xb8] sm:$0xff] }
  0x4e   : > { %593 = vst.msk [vmem:[#allocation2 + $0x128] sm:$0xff] %vm554_vm0, %v3681_v29 }
  0x4f   : > { %595 = vst.msk [vmem:[#allocation2 + $0x138] sm:$0xff] %vm554_vm0, %v3681_v29 }
  0x50   : > { %596 = vst.msk [vmem:[#allocation2 + $0x140] sm:$0xff] %vm554_vm0, %v3681_v29 }
  0x51   : > { %440 = vmatpush.bf16.msra.mxu0 %v3410_v7  ;;  %598 = vst.msk [vmem:[#allocation2 + $0x150] sm:$0xff] %vm554_vm0, %v3681_v29  ;;  %v360_v7 = vpack.c.bf16 %v340_v6, %v339_v5 }
  0x52   : > { %599 = vst.msk [vmem:[#allocation2 + $0x158] sm:$0xff] %vm554_vm0, %v3681_v29 }
  0x53   : > { %601 = vst.msk [vmem:[#allocation2 + $0x168] sm:$0xff] %vm554_vm0, %v3681_v29 }
  0x54   : > { %441 = vmatmul.bf16.vlgmr.msra.gmra.mxu0 %v349_v10  ;;  %602 = vst.msk [vmem:[#allocation2 + $0x170] sm:$0xff] %vm554_vm0, %v3681_v29 }
  0x55   : > { %604 = vst.msk [vmem:[#allocation2 + $0x180] sm:$0xff] %vm554_vm0, %v3681_v29  ;;  %814 = vmatpush.bf16.msrb.mxu0 %v3421_v48 }
  0x56   : > { %605 = vst.msk [vmem:[#allocation2 + $0x188] sm:$0xff] %vm554_vm0, %v3681_v29 }
  0x57   : > { %607 = vst.msk [vmem:[#allocation2 + $0x198] sm:$0xff] %vm554_vm0, %v3681_v29 }
  0x58   : > { %608 = vst.msk [vmem:[#allocation2 + $0x1a0] sm:$0xff] %vm554_vm0, %v3681_v29 }
  0x59   : > { %561 = vst.msk [vmem:[#allocation2 + $0x28] sm:$0x3] %vm557_vm1, %v3681_v29  ;;  %815 = vmatpush.bf16.msrb.mxu0 %v3420_v51 }
  0x5a   : > { %558 = vst.msk [vmem:[#allocation2 + $0x10] sm:$0x3] %vm557_vm1, %v3681_v29 }
  0x5b   : > { %564 = vst.msk [vmem:[#allocation2 + $0x40] sm:$0x3] %vm557_vm1, %v3681_v29 }
  0x5c   : > { %567 = vst.msk [vmem:[#allocation2 + $0x58] sm:$0x3] %vm557_vm1, %v3681_v29 }
  0x5d   : > { %570 = vst.msk [vmem:[#allocation2 + $0x70] sm:$0x3] %vm557_vm1, %v3681_v29  ;;  %963 = vmatpush.bf16.msra.mxu0 %v3419_v49 }
  0x5e   : > { %573 = vst.msk [vmem:[#allocation2 + $0x88] sm:$0x3] %vm557_vm1, %v3681_v29 }
  0x5f   : > { %576 = vst.msk [vmem:[#allocation2 + $0xa0] sm:$0x3] %vm557_vm1, %v3681_v29 }
  0x60   : > { %579 = vst.msk [vmem:[#allocation2 + $0xb8] sm:$0x3] %vm557_vm1, %v3681_v29 }
  0x61   : > { %582 = vst.msk [vmem:[#allocation2 + $0xd0] sm:$0x3] %vm557_vm1, %v3681_v29  ;;  %964 = vmatpush.bf16.msra.mxu0 %v3418_v52 }
  0x62   : > { %585 = vst.msk [vmem:[#allocation2 + $0xe8] sm:$0x3] %vm557_vm1, %v3681_v29 }
  0x63   : > { %588 = vst.msk [vmem:[#allocation2 + $0x100] sm:$0x3] %vm557_vm1, %v3681_v29 }
  0x64   : > { %446 = vmatmul.bf16.gmra.mxu0 %v350_v13  ;;  %591 = vst.msk [vmem:[#allocation2 + $0x118] sm:$0x3] %vm557_vm1, %v3681_v29 }
  0x65   : > { %594 = vst.msk [vmem:[#allocation2 + $0x130] sm:$0x3] %vm557_vm1, %v3681_v29 }
  0x66   : > { %597 = vst.msk [vmem:[#allocation2 + $0x148] sm:$0x3] %vm557_vm1, %v3681_v29 }
  0x67   : > { %600 = vst.msk [vmem:[#allocation2 + $0x160] sm:$0x3] %vm557_vm1, %v3681_v29 }
  0x68   : > { %603 = vst.msk [vmem:[#allocation2 + $0x178] sm:$0x3] %vm557_vm1, %v3681_v29 }
  0x69   : > { %606 = vst.msk [vmem:[#allocation2 + $0x190] sm:$0x3] %vm557_vm1, %v3681_v29 }
  0x6a   : > { %609 = vst.msk [vmem:[#allocation2 + $0x1a8] sm:$0x3] %vm557_vm1, %v3681_v29 }
  0x74   : > { %451 = vmatmul.bf16.gmra.mxu0 %v351_v16 }
  0x84   : > { %456 = vmatmul.bf16.gmra.mxu0 %v352_v19 }
  0x94   : > { %461 = vmatmul.bf16.gmra.mxu0 %v353_v22 }
  0xa4   : > { %466 = vmatmul.bf16.gmra.mxu0 %v354_v25  ;;  %v361_v25 = vpack.c.bf16 %v342_v24, %v341_v23 }
  0xb4   : > { %471 = vmatmul.bf16.gmra.mxu0 %v355_v28 }
  0xc4   : > { %476 = vmatmul.bf16.gmra.mxu0 %v356_v32 }
  0xd1   : > { %v442_v37 = vpop.f32.mrf.mxu0 }
  0xd2   : > { %v443_v38 = vadd.f32 %v3930_v35, %v442_v37 }
  0xd4   : > { %v522_v39 = vmax.f32 %v443_v38, 0.0  ;;  %481 = vmatmul.bf16.gmra.mxu0 %v357_v36 }
  0xd6   : > { %611 = vst.msk [vmem:[#allocation2 + $0x19] sm:$0xff] %vm554_vm0, %v522_v39 }
  0xd9   : > { %v444_v40 = vpop.f32.mrf.mxu0 }
  0xda   : > { %v445_v41 = vadd.f32 %v3930_v35, %v444_v40 }
  0xdc   : > { %v523_v42 = vmax.f32 %v445_v41, 0.0 }
  0xde   : > { %612 = vst.msk [vmem:[#allocation2 + $0x21] sm:$0xff] %vm554_vm0, %v523_v42  ;;  %v343_v42 = vld [vmem:[%s3825_s29 + $0xd0] sm:$0xff] }
  0xdf   : > { %v362_v44 = vpack.c.bf16 %v344_v43, %v343_v42  ;;  %v696_v42 = vld [vmem:[#allocation2 + $0x9] sm:$0xff] }
  0xe0   : > { %v3426_v43 = vld [vmem:[#allocation6 + $0x40] sm:$0xff] }
  0xe1   : > { %v447_v46 = vpop.f32.mrf.mxu0  ;;  %1634 = vmatpush.bf16.msrb.mxu2 %v3426_v43 }
  0xe2   : > { %v448_v47 = vadd.f32 %v3930_v35, %v447_v46 }
  0xe4   : > { %486 = vmatmul.bf16.gmra.mxu0 %v358_v45  ;;  %v524_v53 = vmax.f32 %v448_v47, 0.0 }
  0xe6   : > { %613 = vst.msk [vmem:[#allocation2 + $0x31] sm:$0xff] %vm554_vm0, %v524_v53 }
  0xe9   : > { %v449_v54 = vpop.f32.mrf.mxu0 }
  0xea   : > { %v450_v57 = vadd.f32 %v3930_v35, %v449_v54 }
  0xec   : > { %v525_v58 = vmax.f32 %v450_v57, 0.0 }
  0xee   : > { %614 = vst.msk [vmem:[#allocation2 + $0x39] sm:$0xff] %vm554_vm0, %v525_v58 }
  0xf1   : > { %v452_v63 = vpop.f32.mrf.mxu0 }
  0xf2   : > { %v453_v0 = vadd.f32 %v3930_v35, %v452_v63  ;;  %v346_v63 = vld [vmem:[%s3825_s29 + $0xe8] sm:$0xff] }
  0xf4   : > { %v526_v1 = vmax.f32 %v453_v0, 0.0  ;;  %491 = vmatmul.bf16.gmra.mxu0 %v359_v62  ;;  %v345_v62 = vld [vmem:[%s3825_s29 + $0xe0] sm:$0xff] }
  0xf5   : > { %v363_v0 = vpack.c.bf16 %v346_v63, %v345_v62 }
  0xf6   : > { %615 = vst.msk [vmem:[#allocation2 + $0x49] sm:$0xff] %vm554_vm0, %v526_v1 }
  0xf9   : > { %v454_v2 = vpop.f32.mrf.mxu0 }
  0xfa   : > { %v455_v3 = vadd.f32 %v3930_v35, %v454_v2 }
  0xfc   : > { %v527_v4 = vmax.f32 %v455_v3, 0.0 }
  0xfd   : > { %v701_v11 = vld [vmem:[#allocation2 + $0x49] sm:$0xff] }
  0xfe   : > { %616 = vst.msk [vmem:[#allocation2 + $0x51] sm:$0xff] %vm554_vm0, %v527_v4  ;;  %v649_v12 = vld [vmem:[#allocation2 + $0x48] sm:$0xff] }
 0x101   : > { %v457_v8 = vpop.f32.mrf.mxu0 }
 0x102   : > { %v458_v9 = vadd.f32 %v3930_v35, %v457_v8 }
 0x104   : > { %v528_v10 = vmax.f32 %v458_v9, 0.0  ;;  %496 = vmatmul.bf16.gmra.mxu0 %v360_v7 }
 0x105   : > { %v702_v13 = vld [vmem:[#allocation2 + $0x51] sm:$0xff] }
 0x106   : > { %v650_v14 = vld [vmem:[#allocation2 + $0x50] sm:$0xff]  ;;  %617 = vst.msk [vmem:[#allocation2 + $0x61] sm:$0xff] %vm554_vm0, %v528_v10  ;;  %v4016_v16 = vpack.c.bf16 %v702_v13, %v701_v11 }
 0x107   : > { %v1052_v15 = vld [vmem:[#allocation2 + $0x4a] sm:$0xff]  ;;  %v4018_v17 = vpack.c.bf16 %v650_v14, %v649_v12  ;;  %v1053_v18 = vld [vmem:[#allocation2 + $0x52] sm:$0xff] }
 0x108   : > { %v4020_v19 = vpack.c.bf16 %v1053_v18, %v1052_v15  ;;  %3175 = vmatmul.msk.bf16.vlgmr.msra.gmra.mxu1 %vm554_vm0, %v4016_v16  ;;  %v347_v18 = vld [vmem:[%s3825_s29 + $0xf0] sm:$0xff] }
 0x109   : > { %3199 = vmatmul.msk.bf16.vlgmr.msra.gmra.mxu2 %vm554_vm0, %v4018_v17  ;;  %v459_v20 = vpop.f32.mrf.mxu0 }
 0x10a   : > { %3223 = vmatmul.msk.bf16.vlgmr.msra.gmra.mxu3 %vm554_vm0, %v4020_v19  ;;  %v460_v21 = vadd.f32 %v3930_v35, %v459_v20  ;;  %v348_v20 = vld [vmem:[%s3825_s29 + $0xf8] sm:$0xff] }
 0x10c   : > { %v529_v22 = vmax.f32 %v460_v21, 0.0  ;;  %v364_v21 = vpack.c.bf16 %v348_v20, %v347_v18 }
 0x10d   : > { %v703_v29 = vld [vmem:[#allocation2 + $0x61] sm:$0xff] }
 0x10e   : > { %618 = vst.msk [vmem:[#allocation2 + $0x69] sm:$0xff] %vm554_vm0, %v529_v22  ;;  %v651_v30 = vld [vmem:[#allocation2 + $0x60] sm:$0xff] }
 0x111   : > { %v462_v26 = vpop.f32.mrf.mxu0 }
 0x112   : > { %v463_v27 = vadd.f32 %v3930_v35, %v462_v26 }
 0x114   : > { %v530_v28 = vmax.f32 %v463_v27, 0.0  ;;  %501 = vmatmul.bf16.gmra.mxu0 %v361_v25 }
 0x115   : > { %v704_v31 = vld [vmem:[#allocation2 + $0x69] sm:$0xff] }
 0x116   : > { %v652_v32 = vld [vmem:[#allocation2 + $0x68] sm:$0xff]  ;;  %619 = vst.msk [vmem:[#allocation2 + $0x79] sm:$0xff] %vm554_vm0, %v530_v28  ;;  %v4034_v34 = vpack.c.bf16 %v704_v31, %v703_v29 }
 0x117   : > { %v1054_v33 = vld [vmem:[#allocation2 + $0x62] sm:$0xff]  ;;  %v4036_v36 = vpack.c.bf16 %v652_v32, %v651_v30  ;;  %v1055_v37 = vld [vmem:[#allocation2 + $0x6a] sm:$0xff] }
 0x118   : > { %v4038_v38 = vpack.c.bf16 %v1055_v37, %v1054_v33  ;;  %3176 = vmatmul.msk.bf16.gmra.mxu1 %vm554_vm0, %v4034_v34 }
 0x119   : > { %3200 = vmatmul.msk.bf16.gmra.mxu2 %vm554_vm0, %v4036_v36  ;;  %v464_v39 = vpop.f32.mrf.mxu0 }
 0x11a   : > { %3224 = vmatmul.msk.bf16.gmra.mxu3 %vm554_vm0, %v4038_v38  ;;  %v465_v40 = vadd.f32 %v3930_v35, %v464_v39 }
 0x11c   : > { %v531_v41 = vmax.f32 %v465_v40, 0.0 }
 0x11d   : > { %v705_v48 = vld [vmem:[#allocation2 + $0x79] sm:$0xff] }
 0x11e   : > { %620 = vst.msk [vmem:[#allocation2 + $0x81] sm:$0xff] %vm554_vm0, %v531_v41  ;;  %v653_v49 = vld [vmem:[#allocation2 + $0x78] sm:$0xff]  ;;  %v695_v41 = vld [vmem:[#allocation2 + $0x1] sm:$0xff] }
 0x121   : > { %v467_v45 = vpop.f32.mrf.mxu0 }
 0x122   : > { %v468_v46 = vadd.f32 %v3930_v35, %v467_v45 }
 0x124   : > { %v532_v47 = vmax.f32 %v468_v46, 0.0  ;;  %506 = vmatmul.bf16.gmra.mxu0 %v362_v44  ;;  %v727_v44 = vpack.c.bf16 %v696_v42, %v695_v41 }
 0x125   : > { %v706_v51 = vld [vmem:[#allocation2 + $0x81] sm:$0xff] }
 0x126   : > { %v654_v52 = vld [vmem:[#allocation2 + $0x80] sm:$0xff]  ;;  %621 = vst.msk [vmem:[#allocation2 + $0x91] sm:$0xff] %vm554_vm0, %v532_v47  ;;  %v4052_v54 = vpack.c.bf16 %v706_v51, %v705_v48 }
 0x127   : > { %v1056_v53 = vld [vmem:[#allocation2 + $0x7a] sm:$0xff]  ;;  %v4054_v56 = vpack.c.bf16 %v654_v52, %v653_v49  ;;  %v1057_v57 = vld [vmem:[#allocation2 + $0x82] sm:$0xff] }
 0x128   : > { %v4056_v58 = vpack.c.bf16 %v1057_v57, %v1056_v53  ;;  %3177 = vmatmul.msk.bf16.gmra.mxu1 %vm554_vm0, %v4052_v54 }
 0x129   : > { %3201 = vmatmul.msk.bf16.gmra.mxu2 %vm554_vm0, %v4054_v56  ;;  %v469_v59 = vpop.f32.mrf.mxu0 }
 0x12a   : > { %3225 = vmatmul.msk.bf16.gmra.mxu3 %vm554_vm0, %v4056_v58  ;;  %v470_v60 = vadd.f32 %v3930_v35, %v469_v59 }
 0x12c   : > { %v533_v61 = vmax.f32 %v470_v60, 0.0 }
 0x12d   : > { %v707_v4 = vld [vmem:[#allocation2 + $0x91] sm:$0xff] }
 0x12e   : > { %622 = vst.msk [vmem:[#allocation2 + $0x99] sm:$0xff] %vm554_vm0, %v533_v61  ;;  %v655_v5 = vld [vmem:[#allocation2 + $0x90] sm:$0xff]  ;;  %v3424_v61 = vld [vmem:[#allocation6 + $0x30] sm:$0xff] }
 0x12f   : > { %1400 = vmatpush.bf16.msrb.mxu1 %v3424_v61 }
 0x131   : > { %v472_v1 = vpop.f32.mrf.mxu0 }
 0x132   : > { %v473_v2 = vadd.f32 %v3930_v35, %v472_v1  ;;  %v698_v1 = vld [vmem:[#allocation2 + $0x21] sm:$0xff] }
 0x134   : > { %v534_v3 = vmax.f32 %v473_v2, 0.0  ;;  %511 = vmatmul.bf16.gmra.mxu0 %v363_v0 }
 0x135   : > { %v708_v6 = vld [vmem:[#allocation2 + $0x99] sm:$0xff] }
 0x136   : > { %v656_v7 = vld [vmem:[#allocation2 + $0x98] sm:$0xff]  ;;  %623 = vst.msk [vmem:[#allocation2 + $0xa9] sm:$0xff] %vm554_vm0, %v534_v3  ;;  %v4070_v9 = vpack.c.bf16 %v708_v6, %v707_v4 }
 0x137   : > { %v1058_v8 = vld [vmem:[#allocation2 + $0x92] sm:$0xff]  ;;  %v4072_v10 = vpack.c.bf16 %v656_v7, %v655_v5  ;;  %v1059_v11 = vld [vmem:[#allocation2 + $0x9a] sm:$0xff] }
 0x138   : > { %v4074_v12 = vpack.c.bf16 %v1059_v11, %v1058_v8  ;;  %3178 = vmatmul.msk.bf16.gmra.mxu1 %vm554_vm0, %v4070_v9  ;;  %v697_v3 = vld [vmem:[#allocation2 + $0x19] sm:$0xff] }
 0x139   : > { %3202 = vmatmul.msk.bf16.gmra.mxu2 %vm554_vm0, %v4072_v10  ;;  %v474_v13 = vpop.f32.mrf.mxu0  ;;  %v4122_v5 = vpack.c.bf16 %v698_v1, %v697_v3 }
 0x13a   : > { %3226 = vmatmul.msk.bf16.gmra.mxu3 %vm554_vm0, %v4074_v12  ;;  %v475_v14 = vadd.f32 %v3930_v35, %v474_v13 }
 0x13c   : > { %v535_v15 = vmax.f32 %v475_v14, 0.0 }
 0x13d   : > { %v709_v25 = vld [vmem:[#allocation2 + $0xa9] sm:$0xff] }
 0x13e   : > { %624 = vst.msk [vmem:[#allocation2 + $0xb1] sm:$0xff] %vm554_vm0, %v535_v15  ;;  %v657_v26 = vld [vmem:[#allocation2 + $0xa8] sm:$0xff] }
 0x141   : > { %v477_v22 = vpop.f32.mrf.mxu0 }
 0x142   : > { %v478_v23 = vadd.f32 %v3930_v35, %v477_v22 }
 0x144   : > { %v536_v24 = vmax.f32 %v478_v23, 0.0  ;;  %516 = vmatmul.bf16.gmra.mxu0 %v364_v21 }
 0x145   : > { %v710_v27 = vld [vmem:[#allocation2 + $0xb1] sm:$0xff] }
 0x146   : > { %v658_v28 = vld [vmem:[#allocation2 + $0xb0] sm:$0xff]  ;;  %625 = vst.msk [vmem:[#allocation2 + $0xc1] sm:$0xff] %vm554_vm0, %v536_v24  ;;  %v4088_v30 = vpack.c.bf16 %v710_v27, %v709_v25  ;;  %v700_v24 = vld [vmem:[#allocation2 + $0x39] sm:$0xff] }
 0x147   : > { %v1060_v29 = vld [vmem:[#allocation2 + $0xaa] sm:$0xff]  ;;  %v4090_v31 = vpack.c.bf16 %v658_v28, %v657_v26  ;;  %v1061_v32 = vld [vmem:[#allocation2 + $0xb2] sm:$0xff] }
 0x148   : > { %v4092_v33 = vpack.c.bf16 %v1061_v32, %v1060_v29  ;;  %3179 = vmatmul.msk.bf16.gmra.mxu1 %vm554_vm0, %v4088_v30  ;;  %v699_v26 = vld [vmem:[#allocation2 + $0x31] sm:$0xff] }
 0x149   : > { %3203 = vmatmul.msk.bf16.gmra.mxu2 %vm554_vm0, %v4090_v31  ;;  %v479_v37 = vpop.f32.mrf.mxu0  ;;  %v4142_v28 = vpack.c.bf16 %v700_v24, %v699_v26  ;;  %v646_v26 = vld [vmem:[#allocation2 + $0x20] sm:$0xff] }
 0x14a   : > { %3227 = vmatmul.msk.bf16.gmra.mxu3 %vm554_vm0, %v4092_v33  ;;  %v480_v39 = vadd.f32 %v3930_v35, %v479_v37 }
 0x14c   : > { %v537_v40 = vmax.f32 %v480_v39, 0.0 }
 0x14d   : > { %v711_v48 = vld [vmem:[#allocation2 + $0xc1] sm:$0xff] }
 0x14e   : > { %626 = vst.msk [vmem:[#allocation2 + $0xc9] sm:$0xff] %vm554_vm0, %v537_v40  ;;  %v659_v49 = vld [vmem:[#allocation2 + $0xc0] sm:$0xff] }
 0x151   : > { %v482_v45 = vpop.f32.mrf.mxu0 }
 0x152   : > { %v483_v46 = vadd.f32 %v3930_v35, %v482_v45 }
 0x154   : > { %v538_v47 = vmax.f32 %v483_v46, 0.0  ;;  %3172 = vmatmul.msk.bf16.vlgmr.msrb.gmra.mxu0 %vm554_vm0, %v727_v44 }
 0x155   : > { %v712_v51 = vld [vmem:[#allocation2 + $0xc9] sm:$0xff]  ;;  %1165 = vmatpush.bf16.msrb.mxu0 %v3985_v50 }
 0x156   : > { %v660_v52 = vld [vmem:[#allocation2 + $0xc8] sm:$0xff]  ;;  %627 = vst.msk [vmem:[#allocation2 + $0xd9] sm:$0xff] %vm554_vm0, %v538_v47  ;;  %v4106_v57 = vpack.c.bf16 %v712_v51, %v711_v48 }
 0x157   : > { %v1062_v53 = vld [vmem:[#allocation2 + $0xc2] sm:$0xff]  ;;  %v4108_v59 = vpack.c.bf16 %v660_v52, %v659_v49  ;;  %v1063_v60 = vld [vmem:[#allocation2 + $0xca] sm:$0xff] }
 0x158   : > { %v4110_v62 = vpack.c.bf16 %v1063_v60, %v1062_v53  ;;  %3180 = vmatmul.msk.bf16.gmra.mxu1 %vm554_vm0, %v4106_v57  ;;  %v643_v49 = vld [vmem:[#allocation2] sm:$0xff]  ;;  %v644_v51 = vld [vmem:[#allocation2 + $0x8] sm:$0xff] }
 0x159   : > { %3204 = vmatmul.msk.bf16.gmra.mxu2 %vm554_vm0, %v4108_v59  ;;  %v484_v50 = vpop.f32.mrf.mxu0  ;;  %1166 = vmatpush.bf16.msrb.mxu0 %v3994_v55  ;;  %v3429_v52 = vld [vmem:[#allocation6 + $0x58] sm:$0xff]  ;;  %v675_v53 = vpack.c.bf16 %v644_v51, %v643_v49 }
 0x15a   : > { %3228 = vmatmul.msk.bf16.gmra.mxu3 %vm554_vm0, %v4110_v62  ;;  %v485_v63 = vadd.f32 %v3930_v35, %v484_v50 }
 0x15b   : > { %1867 = vmatpush.bf16.msrb.mxu3 %v3429_v52 }
 0x15c   : > { %v539_v0 = vmax.f32 %v485_v63, 0.0 }
 0x15d   : > { %v713_v7 = vld [vmem:[#allocation2 + $0xd9] sm:$0xff] }
 0x15e   : > { %628 = vst.msk [vmem:[#allocation2 + $0xe1] sm:$0xff] %vm554_vm0, %v539_v0  ;;  %v661_v8 = vld [vmem:[#allocation2 + $0xd8] sm:$0xff] }
 0x161   : > { %v487_v2 = vpop.f32.mrf.mxu0 }
 0x162   : > { %v488_v4 = vadd.f32 %v3930_v35, %v487_v2 }
 0x164   : > { %v540_v6 = vmax.f32 %v488_v4, 0.0  ;;  %3173 = vmatmul.msk.bf16.gmra.mxu0 %vm554_vm0, %v4122_v5 }
 0x165   : > { %v714_v11 = vld [vmem:[#allocation2 + $0xe1] sm:$0xff] }
 0x166   : > { %v662_v13 = vld [vmem:[#allocation2 + $0xe0] sm:$0xff]  ;;  %629 = vst.msk [vmem:[#allocation2 + $0xf1] sm:$0xff] %vm554_vm0, %v540_v6  ;;  %v4127_v55 = vpack.c.bf16 %v714_v11, %v713_v7 }
 0x167   : > { %v1064_v14 = vld [vmem:[#allocation2 + $0xda] sm:$0xff]  ;;  %v4129_v15 = vpack.c.bf16 %v662_v13, %v661_v8  ;;  %v1065_v18 = vld [vmem:[#allocation2 + $0xe2] sm:$0xff] }
 0x168   : > { %v4131_v20 = vpack.c.bf16 %v1065_v18, %v1064_v14  ;;  %3181 = vmatmul.msk.bf16.gmra.mxu1 %vm554_vm0, %v4127_v55 }
 0x169   : > { %3205 = vmatmul.msk.bf16.gmra.mxu2 %vm554_vm0, %v4129_v15  ;;  %v489_v21 = vpop.f32.mrf.mxu0 }
 0x16a   : > { %3229 = vmatmul.msk.bf16.gmra.mxu3 %vm554_vm0, %v4131_v20  ;;  %v490_v22 = vadd.f32 %v3930_v35, %v489_v21 }
 0x16c   : > { %v541_v23 = vmax.f32 %v490_v22, 0.0 }
 0x16d   : > { %v715_v32 = vld [vmem:[#allocation2 + $0xf1] sm:$0xff] }
 0x16e   : > { %630 = vst.msk [vmem:[#allocation2 + $0xf9] sm:$0xff] %vm554_vm0, %v541_v23  ;;  %v663_v37 = vld [vmem:[#allocation2 + $0xf0] sm:$0xff] }
 0x171   : > { %v492_v25 = vpop.f32.mrf.mxu0 }
 0x172   : > { %v493_v27 = vadd.f32 %v3930_v35, %v492_v25 }
 0x174   : > { %v542_v29 = vmax.f32 %v493_v27, 0.0  ;;  %3174 = vmatmul.msk.bf16.gmra.mxu0 %vm554_vm0, %v4142_v28 }
 0x175   : > { %v716_v39 = vld [vmem:[#allocation2 + $0xf9] sm:$0xff] }
 0x176   : > { %v664_v40 = vld [vmem:[#allocation2 + $0xf8] sm:$0xff]  ;;  %631 = vst.msk [vmem:[#allocation2 + $0x109] sm:$0xff] %vm554_vm0, %v542_v29  ;;  %v4147_v42 = vpack.c.bf16 %v716_v39, %v715_v32 }
 0x177   : > { %v1066_v41 = vld [vmem:[#allocation2 + $0xf2] sm:$0xff]  ;;  %v4149_v43 = vpack.c.bf16 %v664_v40, %v663_v37  ;;  %v1067_v44 = vld [vmem:[#allocation2 + $0xfa] sm:$0xff] }
 0x178   : > { %v4151_v45 = vpack.c.bf16 %v1067_v44, %v1066_v41  ;;  %3182 = vmatmul.msk.bf16.gmra.mxu1 %vm554_vm0, %v4147_v42  ;;  %v645_v29 = vld [vmem:[#allocation2 + $0x18] sm:$0xff] }
 0x179   : > { %3206 = vmatmul.msk.bf16.gmra.mxu2 %vm554_vm0, %v4149_v43  ;;  %v494_v46 = vpop.f32.mrf.mxu0  ;;  %v4181_v37 = vpack.c.bf16 %v646_v26, %v645_v29 }
 0x17a   : > { %3230 = vmatmul.msk.bf16.gmra.mxu3 %vm554_vm0, %v4151_v45  ;;  %v495_v47 = vadd.f32 %v3930_v35, %v494_v46 }
 0x17c   : > { %v543_v48 = vmax.f32 %v495_v47, 0.0 }
 0x17d   : > { %v717_v63 = vld [vmem:[#allocation2 + $0x109] sm:$0xff] }
 0x17e   : > { %632 = vst.msk [vmem:[#allocation2 + $0x111] sm:$0xff] %vm554_vm0, %v543_v48  ;;  %v665_v0 = vld [vmem:[#allocation2 + $0x108] sm:$0xff] }
 0x181   : > { %v497_v60 = vpop.f32.mrf.mxu0 }
 0x182   : > { %v498_v61 = vadd.f32 %v3930_v35, %v497_v60 }
 0x184   : > { %v544_v50 = vmax.f32 %v498_v61, 0.0  ;;  %3196 = vmatmul.msk.bf16.vlgmr.msra.gmra.mxu0 %vm554_vm0, %v675_v53 }
 0x185   : > { %v832_v1 = vpop.f32.mrf.mxu1  ;;  %v718_v2 = vld [vmem:[#allocation2 + $0x111] sm:$0xff] }
 0x186   : > { %v666_v3 = vld [vmem:[#allocation2 + $0x110] sm:$0xff]  ;;  %633 = vst.msk [vmem:[#allocation2 + $0x121] sm:$0xff] %vm554_vm0, %v544_v50  ;;  %v4164_v6 = vpack.c.bf16 %v718_v2, %v717_v63 }
 0x187   : > { %v1068_v4 = vld [vmem:[#allocation2 + $0x10a] sm:$0xff]  ;;  %v4166_v7 = vpack.c.bf16 %v666_v3, %v665_v0  ;;  %v1069_v8 = vld [vmem:[#allocation2 + $0x112] sm:$0xff] }
 0x188   : > { %v4168_v11 = vpack.c.bf16 %v1069_v8, %v1068_v4  ;;  %3183 = vmatmul.msk.bf16.gmra.mxu1 %vm554_vm0, %v4164_v6 }
 0x189   : > { %3207 = vmatmul.msk.bf16.gmra.mxu2 %vm554_vm0, %v4166_v7  ;;  %v499_v13 = vpop.f32.mrf.mxu0 }
 0x18a   : > { %3231 = vmatmul.msk.bf16.gmra.mxu3 %vm554_vm0, %v4168_v11  ;;  %v500_v14 = vadd.f32 %v3930_v35, %v499_v13 }
 0x18c   : > { %v981_v18 = vpop.f32.mrf.mxu2  ;;  %v545_v21 = vmax.f32 %v500_v14, 0.0 }
 0x18d   : > { %v982_v22 = vadd.f32 %v981_v18, %v832_v1  ;;  %v1183_v23 = vpop.f32.mrf.mxu3  ;;  %v834_v24 = vpop.f32.mrf.mxu1  ;;  %v719_v46 = vld [vmem:[#allocation2 + $0x121] sm:$0xff]  ;;  %v648_v18 = vld [vmem:[#allocation2 + $0x38] sm:$0xff] }
 0x18e   : > { %634 = vst.msk [vmem:[#allocation2 + $0x129] sm:$0xff] %vm554_vm0, %v545_v21  ;;  %v667_v47 = vld [vmem:[#allocation2 + $0x120] sm:$0xff] }
 0x18f   : > { %v4178_v25 = vadd.f32 %v1183_v23, %v982_v22  ;;  %v647_v22 = vld [vmem:[#allocation2 + $0x30] sm:$0xff] }
 0x191   : > { %v502_v27 = vpop.f32.mrf.mxu0 }
 0x192   : > { %v503_v32 = vadd.f32 %v3930_v35, %v502_v27 }
 0x194   : > { %v983_v39 = vpop.f32.mrf.mxu2  ;;  %v546_v40 = vmax.f32 %v503_v32, 0.0  ;;  %3197 = vmatmul.msk.bf16.gmra.mxu0 %vm554_vm0, %v4181_v37 }
 0x195   : > { %v984_v41 = vadd.f32 %v983_v39, %v834_v24  ;;  %v1185_v44 = vpop.f32.mrf.mxu3  ;;  %v837_v48 = vpop.f32.mrf.mxu1  ;;  %v720_v49 = vld [vmem:[#allocation2 + $0x129] sm:$0xff]  ;;  %v4205_v24 = vpack.c.bf16 %v648_v18, %v647_v22 }
 0x196   : > { %v668_v51 = vld [vmem:[#allocation2 + $0x128] sm:$0xff]  ;;  %635 = vst.msk [vmem:[#allocation2 + $0x139] sm:$0xff] %vm554_vm0, %v546_v40  ;;  %v4188_v60 = vpack.c.bf16 %v720_v49, %v719_v46 }
 0x197   : > { %v1070_v52 = vld [vmem:[#allocation2 + $0x122] sm:$0xff]  ;;  %v4186_v53 = vadd.f32 %v1185_v44, %v984_v41  ;;  %v4190_v61 = vpack.c.bf16 %v668_v51, %v667_v47  ;;  %v1071_v50 = vld [vmem:[#allocation2 + $0x12a] sm:$0xff] }
 0x198   : > { %v4192_v63 = vpack.c.bf16 %v1071_v50, %v1070_v52  ;;  %3184 = vmatmul.msk.bf16.gmra.mxu1 %vm554_vm0, %v4188_v60  ;;  %v1046_v18 = vld [vmem:[#allocation2 + $0x2] sm:$0xff] }
 0x199   : > { %3208 = vmatmul.msk.bf16.gmra.mxu2 %vm554_vm0, %v4190_v61  ;;  %v504_v0 = vpop.f32.mrf.mxu0 }
 0x19a   : > { %3232 = vmatmul.msk.bf16.gmra.mxu3 %vm554_vm0, %v4192_v63  ;;  %v505_v1 = vadd.f32 %v3930_v35, %v504_v0 }
 0x19c   : > { %v986_v2 = vpop.f32.mrf.mxu2  ;;  %v547_v3 = vmax.f32 %v505_v1, 0.0 }
 0x19d   : > { %v987_v4 = vadd.f32 %v986_v2, %v837_v48  ;;  %v1188_v8 = vpop.f32.mrf.mxu3  ;;  %v839_v13 = vpop.f32.mrf.mxu1  ;;  %v721_v39 = vld [vmem:[#allocation2 + $0x139] sm:$0xff] }
 0x19e   : > { %636 = vst.msk [vmem:[#allocation2 + $0x141] sm:$0xff] %vm554_vm0, %v547_v3  ;;  %v669_v40 = vld [vmem:[#allocation2 + $0x138] sm:$0xff] }
 0x19f   : > { %v4202_v14 = vadd.f32 %v1188_v8, %v987_v4 }
 0x1a1   : > { %v507_v21 = vpop.f32.mrf.mxu0 }
 0x1a2   : > { %v508_v23 = vadd.f32 %v3930_v35, %v507_v21  ;;  %v1047_v21 = vld [vmem:[#allocation2 + $0xa] sm:$0xff] }
 0x1a4   : > { %v988_v26 = vpop.f32.mrf.mxu2  ;;  %v548_v27 = vmax.f32 %v508_v23, 0.0  ;;  %3198 = vmatmul.msk.bf16.gmra.mxu0 %vm554_vm0, %v4205_v24  ;;  %v1078_v23 = vpack.c.bf16 %v1047_v21, %v1046_v18  ;;  %v3435_v21 = vld [vmem:[#allocation6 + $0x88] sm:$0xff] }
 0x1a5   : > { %v989_v29 = vadd.f32 %v988_v26, %v839_v13  ;;  %v1190_v32 = vpop.f32.mrf.mxu3  ;;  %v842_v41 = vpop.f32.mrf.mxu1  ;;  %v722_v44 = vld [vmem:[#allocation2 + $0x141] sm:$0xff]  ;;  %2570 = vmatpush.bf16.msra.mxu2 %v3435_v21 }
 0x1a6   : > { %v670_v46 = vld [vmem:[#allocation2 + $0x140] sm:$0xff]  ;;  %637 = vst.msk [vmem:[#allocation2 + $0x151] sm:$0xff] %vm554_vm0, %v548_v27  ;;  %v4212_v49 = vpack.c.bf16 %v722_v44, %v721_v39 }
 0x1a7   : > { %v1072_v47 = vld [vmem:[#allocation2 + $0x13a] sm:$0xff]  ;;  %v4210_v48 = vadd.f32 %v1190_v32, %v989_v29  ;;  %v4214_v51 = vpack.c.bf16 %v670_v46, %v669_v40  ;;  %v1073_v52 = vld [vmem:[#allocation2 + $0x142] sm:$0xff] }
 0x1a8   : > { %v4216_v50 = vpack.c.bf16 %v1073_v52, %v1072_v47  ;;  %3185 = vmatmul.msk.bf16.gmra.mxu1 %vm554_vm0, %v4212_v49 }
 0x1a9   : > { %3209 = vmatmul.msk.bf16.gmra.mxu2 %vm554_vm0, %v4214_v51  ;;  %v509_v0 = vpop.f32.mrf.mxu0 }
 0x1aa   : > { %3233 = vmatmul.msk.bf16.gmra.mxu3 %vm554_vm0, %v4216_v50  ;;  %v510_v1 = vadd.f32 %v3930_v35, %v509_v0 }
 0x1ac   : > { %v991_v2 = vpop.f32.mrf.mxu2  ;;  %v549_v3 = vmax.f32 %v510_v1, 0.0 }
 0x1ad   : > { %v992_v4 = vadd.f32 %v991_v2, %v842_v41  ;;  %v1193_v8 = vpop.f32.mrf.mxu3  ;;  %v844_v13 = vpop.f32.mrf.mxu1  ;;  %v723_v44 = vld [vmem:[#allocation2 + $0x151] sm:$0xff] }
 0x1ae   : > { %638 = vst.msk [vmem:[#allocation2 + $0x159] sm:$0xff] %vm554_vm0, %v549_v3  ;;  %v671_v41 = vld [vmem:[#allocation2 + $0x150] sm:$0xff] }
 0x1af   : > { %v4226_v22 = vadd.f32 %v1193_v8, %v992_v4  ;;  %v3428_v8 = vld [vmem:[#allocation6 + $0x50] sm:$0xff] }
 0x1b0   : > { %1868 = vmatpush.bf16.msrb.mxu3 %v3428_v8 }
 0x1b1   : > { %v512_v26 = vpop.f32.mrf.mxu0 }
 0x1b2   : > { %v513_v27 = vadd.f32 %v3930_v35, %v512_v26 }
 0x1b4   : > { %v993_v29 = vpop.f32.mrf.mxu2  ;;  %v550_v32 = vmax.f32 %v513_v27, 0.0  ;;  %3220 = vmatmul.msk.bf16.vlgmr.msrb.gmra.mxu0 %vm554_vm0, %v1078_v23 }
 0x1b5   : > { %v994_v39 = vadd.f32 %v993_v29, %v844_v13  ;;  %v1195_v40 = vpop.f32.mrf.mxu3  ;;  %v847_v46 = vpop.f32.mrf.mxu1  ;;  %v724_v47 = vld [vmem:[#allocation2 + $0x159] sm:$0xff] }
 0x1b6   : > { %v672_v52 = vld [vmem:[#allocation2 + $0x158] sm:$0xff]  ;;  %639 = vst.msk [vmem:[#allocation2 + $0x169] sm:$0xff] %vm554_vm0, %v550_v32  ;;  %v4233_v2 = vpack.c.bf16 %v724_v47, %v723_v44  ;;  %v3433_v44 = vld [vmem:[#allocation6 + $0x78] sm:$0xff] }
 0x1b7   : > { %v1074_v0 = vld [vmem:[#allocation2 + $0x152] sm:$0xff]  ;;  %v4231_v1 = vadd.f32 %v1195_v40, %v994_v39  ;;  %v4235_v3 = vpack.c.bf16 %v672_v52, %v671_v41  ;;  %v1075_v4 = vld [vmem:[#allocation2 + $0x15a] sm:$0xff]  ;;  %v1049_v52 = vld [vmem:[#allocation2 + $0x22] sm:$0xff]  ;;  %2336 = vmatpush.bf16.msra.mxu1 %v3433_v44 }
 0x1b8   : > { %v4237_v13 = vpack.c.bf16 %v1075_v4, %v1074_v0  ;;  %3186 = vmatmul.msk.bf16.gmra.mxu1 %vm554_vm0, %v4233_v2  ;;  %v3431_v41 = vld [vmem:[#allocation6 + $0x68] sm:$0xff]  ;;  %v3430_v4 = vld [vmem:[#allocation6 + $0x60] sm:$0xff] }
 0x1b9   : > { %4858 = vst [vmem:[#allocation12_spill] sm:$0xff] %v4231_v1  ;;  %3210 = vmatmul.msk.bf16.gmra.mxu2 %vm554_vm0, %v4235_v3  ;;  %v514_v18 = vpop.f32.mrf.mxu0  ;;  %v1048_v47 = vld [vmem:[#allocation2 + $0x1a] sm:$0xff]  ;;  %2102 = vmatpush.bf16.msra.mxu0 %v3431_v41 }
 0x1ba   : > { %4859 = vst [vmem:[#allocation13_spill] sm:$0xff] %v4237_v13  ;;  %3234 = vmatmul.msk.bf16.gmra.mxu3 %vm554_vm0, %v4237_v13  ;;  %v515_v23 = vadd.f32 %v3930_v35, %v514_v18  ;;  %v1079_v18 = vpack.c.bf16 %v1049_v52, %v1048_v47 }
 0x1bc   : > { %v996_v26 = vpop.f32.mrf.mxu2  ;;  %v551_v27 = vmax.f32 %v515_v23, 0.0 }
 0x1bd   : > { %v997_v29 = vadd.f32 %v996_v26, %v847_v46  ;;  %v1198_v32 = vpop.f32.mrf.mxu3  ;;  %v849_v39 = vpop.f32.mrf.mxu1  ;;  %2103 = vmatpush.bf16.msra.mxu0 %v3430_v4 }
 0x1be   : > { %640 = vst.msk [vmem:[#allocation2 + $0x171] sm:$0xff] %vm554_vm0, %v551_v27  ;;  %v725_v27 = vld [vmem:[#allocation2 + $0x169] sm:$0xff] }
 0x1bf   : > { %v4247_v40 = vadd.f32 %v1198_v32, %v997_v29  ;;  %v673_v29 = vld [vmem:[#allocation2 + $0x168] sm:$0xff] }
 0x1c1   : > { %4860 = vst [vmem:[#allocation14_spill] sm:$0xff] %v4247_v40  ;;  %v517_v0 = vpop.f32.mrf.mxu0 }
 0x1c2   : > { %v518_v8 = vadd.f32 %v3930_v35, %v517_v0 }
 0x1c4   : > { %v998_v21 = vpop.f32.mrf.mxu2  ;;  %v552_v23 = vmax.f32 %v518_v8, 0.0  ;;  %3221 = vmatmul.msk.bf16.gmra.mxu0 %vm554_vm0, %v1079_v18 }
 0x1c5   : > { %v999_v46 = vadd.f32 %v998_v21, %v849_v39  ;;  %v1200_v26 = vpop.f32.mrf.mxu3  ;;  %v852_v32 = vpop.f32.mrf.mxu1  ;;  %v726_v40 = vld [vmem:[#allocation2 + $0x171] sm:$0xff] }
 0x1c6   : > { %v674_v1 = vld [vmem:[#allocation2 + $0x170] sm:$0xff]  ;;  %641 = vst.msk [vmem:[#allocation2 + $0x181] sm:$0xff] %vm554_vm0, %v552_v23  ;;  %v4254_v41 = vpack.c.bf16 %v726_v40, %v725_v27 }
 0x1c7   : > { %v1076_v13 = vld [vmem:[#allocation2 + $0x16a] sm:$0xff]  ;;  %v4252_v44 = vadd.f32 %v1200_v26, %v999_v46  ;;  %v4256_v47 = vpack.c.bf16 %v674_v1, %v673_v29  ;;  %v1077_v52 = vld [vmem:[#allocation2 + $0x172] sm:$0xff]  ;;  %v1051_v26 = vld [vmem:[#allocation2 + $0x3a] sm:$0xff] }
 0x1c8   : > { %4862 = vst [vmem:[#allocation16_spill] sm:$0xff] %v4254_v41  ;;  %v4258_v39 = vpack.c.bf16 %v1077_v52, %v1076_v13  ;;  %3187 = vmatmul.msk.bf16.gmra.mxu1 %vm554_vm0, %v4254_v41  ;;  %v1050_v46 = vld [vmem:[#allocation2 + $0x32] sm:$0xff] }
 0x1c9   : > { %4861 = vst [vmem:[#allocation15_spill] sm:$0xff] %v4252_v44  ;;  %3211 = vmatmul.msk.bf16.gmra.mxu2 %vm554_vm0, %v4256_v47  ;;  %v519_v0 = vpop.f32.mrf.mxu0  ;;  %v1080_v29 = vpack.c.bf16 %v1051_v26, %v1050_v46 }
 0x1ca   : > { %4863 = vst [vmem:[#allocation17_spill] sm:$0xff] %v4258_v39  ;;  %3235 = vmatmul.msk.bf16.gmra.mxu3 %vm554_vm0, %v4258_v39  ;;  %v520_v4 = vadd.f32 %v3930_v35, %v519_v0 }
 0x1cc   : > { %v1001_v8 = vpop.f32.mrf.mxu2  ;;  %v553_v40 = vmax.f32 %v520_v4, 0.0 }
 0x1cd   : > { %v1002_v21 = vadd.f32 %v1001_v8, %v852_v32  ;;  %v1203_v1 = vpop.f32.mrf.mxu3  ;;  %v854_v23 = vpop.f32.mrf.mxu1 }
 0x1ce   : > { %642 = vst.msk [vmem:[#allocation2 + $0x189] sm:$0xff] %vm554_vm0, %v553_v40 }
 0x1cf   : > { %v4268_v13 = vadd.f32 %v1203_v1, %v1002_v21 }
 0x1d1   : > { %v817_v27 = vpop.f32.mrf.mxu0 }
 0x1d4   : > { %v1003_v52 = vpop.f32.mrf.mxu2  ;;  %3222 = vmatmul.msk.bf16.gmra.mxu0 %vm554_vm0, %v1080_v29 }
 0x1d5   : > { %v1004_v44 = vadd.f32 %v1003_v52, %v854_v23  ;;  %v1205_v41 = vpop.f32.mrf.mxu3  ;;  %v857_v39 = vpop.f32.mrf.mxu1 }
 0x1d7   : > { %v4271_v35 = vadd.f32 %v1205_v41, %v1004_v44 }
 0x1d8   : > { %3244 = vmatmul.msk.bf16.vlgmr.msrb.gmra.mxu1 %vm554_vm0, %v4181_v37 }
 0x1d9   : > { %3268 = vmatmul.msk.bf16.vlgmr.msrb.gmra.mxu2 %vm554_vm0, %v4122_v5  ;;  %v819_v32 = vpop.f32.mrf.mxu0 }
 0x1da   : > { %3292 = vmatmul.msk.bf16.vlgmr.msrb.gmra.mxu3 %vm554_vm0, %v1079_v18 }
 0x1dc   : > { %v1006_v0 = vpop.f32.mrf.mxu2 }
 0x1dd   : > { %v1007_v4 = vadd.f32 %v1006_v0, %v857_v39  ;;  %v1208_v8 = vpop.f32.mrf.mxu3  ;;  %v859_v40 = vpop.f32.mrf.mxu1 }
 0x1df   : > { %v4278_v21 = vadd.f32 %v1208_v8, %v1007_v4 }
 0x1e1   : > { %v822_v1 = vpop.f32.mrf.mxu0 }
 0x1e4   : > { %v1008_v23 = vpop.f32.mrf.mxu2  ;;  %3316 = vmatmul.msk.bf16.vlgmr.msra.gmra.mxu0 %vm554_vm0, %v4205_v24 }
 0x1e5   : > { %v1009_v46 = vadd.f32 %v1008_v23, %v859_v40  ;;  %v1210_v44 = vpop.f32.mrf.mxu3  ;;  %v862_v37 = vpop.f32.mrf.mxu1 }
 0x1e7   : > { %v4282_v41 = vadd.f32 %v1210_v44, %v1009_v46 }
 0x1e8   : > { %3245 = vmatmul.msk.bf16.gmra.mxu1 %vm554_vm0, %v4205_v24 }
 0x1e9   : > { %3269 = vmatmul.msk.bf16.gmra.mxu2 %vm554_vm0, %v4142_v28  ;;  %v824_v5 = vpop.f32.mrf.mxu0 }
 0x1ea   : > { %3293 = vmatmul.msk.bf16.gmra.mxu3 %vm554_vm0, %v1080_v29 }
 0x1ec   : > { %v1011_v18 = vpop.f32.mrf.mxu2 }
 0x1ed   : > { %v1012_v39 = vadd.f32 %v1011_v18, %v862_v37  ;;  %v1213_v26 = vpop.f32.mrf.mxu3  ;;  %v864_v52 = vpop.f32.mrf.mxu1 }
 0x1ef   : > { %v4289_v0 = vadd.f32 %v1213_v26, %v1012_v39 }
 0x1f1   : > { %v827_v4 = vpop.f32.mrf.mxu0 }
 0x1f4   : > { %v1013_v8 = vpop.f32.mrf.mxu2  ;;  %3317 = vmatmul.msk.bf16.gmra.mxu0 %vm554_vm0, %v4018_v17 }
 0x1f5   : > { %v1014_v40 = vadd.f32 %v1013_v8, %v864_v52  ;;  %v1215_v23 = vpop.f32.mrf.mxu3  ;;  %v867_v24 = vpop.f32.mrf.mxu1 }
 0x1f7   : > { %v4293_v46 = vadd.f32 %v1215_v23, %v1014_v40 }
 0x1f8   : > { %3246 = vmatmul.msk.bf16.gmra.mxu1 %vm554_vm0, %v4018_v17 }
 0x1f9   : > { %3270 = vmatmul.msk.bf16.gmra.mxu2 %vm554_vm0, %v4016_v16  ;;  %v829_v28 = vpop.f32.mrf.mxu0 }
 0x1fa   : > { %3294 = vmatmul.msk.bf16.gmra.mxu3 %vm554_vm0, %v4020_v19 }
 0x1fc   : > { %v1016_v29 = vpop.f32.mrf.mxu2 }
 0x1fd   : > { %v1017_v44 = vadd.f32 %v1016_v29, %v867_v24  ;;  %v1218_v37 = vpop.f32.mrf.mxu3  ;;  %v869_v18 = vpop.f32.mrf.mxu1 }
 0x1ff   : > { %v4301_v39 = vadd.f32 %v1218_v37, %v1017_v44 }
 0x201   : > { %v966_v26 = vpop.f32.mrf.mxu0 }
 0x202   : > { %v967_v52 = vadd.f32 %v966_v26, %v817_v27 }
 0x204   : > { %v1018_v8 = vpop.f32.mrf.mxu2  ;;  %3318 = vmatmul.msk.bf16.gmra.mxu0 %vm554_vm0, %v4036_v36 }
 0x205   : > { %v1019_v40 = vadd.f32 %v1018_v8, %v869_v18  ;;  %v1220_v23 = vpop.f32.mrf.mxu3  ;;  %v872_v17 = vpop.f32.mrf.mxu1 }
 0x207   : > { %v4305_v16 = vadd.f32 %v1220_v23, %v1019_v40 }
 0x208   : > { %3247 = vmatmul.msk.bf16.gmra.mxu1 %vm554_vm0, %v4036_v36 }
 0x209   : > { %4864 = vst [vmem:[#allocation18_spill] sm:$0xff] %v4305_v16  ;;  %3271 = vmatmul.msk.bf16.gmra.mxu2 %vm554_vm0, %v4034_v34  ;;  %v968_v19 = vpop.f32.mrf.mxu0 }
 0x20a   : > { %3295 = vmatmul.msk.bf16.gmra.mxu3 %vm554_vm0, %v4038_v38  ;;  %v969_v27 = vadd.f32 %v968_v19, %v819_v32 }
 0x20c   : > { %v1021_v24 = vpop.f32.mrf.mxu2 }
 0x20d   : > { %v1022_v29 = vadd.f32 %v1021_v24, %v872_v17  ;;  %v1223_v44 = vpop.f32.mrf.mxu3  ;;  %v874_v37 = vpop.f32.mrf.mxu1 }
 0x20f   : > { %v4313_v18 = vadd.f32 %v1223_v44, %v1022_v29 }
 0x211   : > { %v971_v26 = vpop.f32.mrf.mxu0 }
 0x212   : > { %v972_v8 = vadd.f32 %v971_v26, %v822_v1 }
 0x214   : > { %v1023_v40 = vpop.f32.mrf.mxu2  ;;  %3319 = vmatmul.msk.bf16.gmra.mxu0 %vm554_vm0, %v4054_v56 }
 0x215   : > { %v1024_v23 = vadd.f32 %v1023_v40, %v874_v37  ;;  %v1225_v16 = vpop.f32.mrf.mxu3  ;;  %v877_v34 = vpop.f32.mrf.mxu1 }
 0x217   : > { %v4317_v36 = vadd.f32 %v1225_v16, %v1024_v23 }
 0x218   : > { %3248 = vmatmul.msk.bf16.gmra.mxu1 %vm554_vm0, %v4054_v56 }
 0x219   : > { %3272 = vmatmul.msk.bf16.gmra.mxu2 %vm554_vm0, %v4052_v54  ;;  %v973_v38 = vpop.f32.mrf.mxu0 }
 0x21a   : > { %3296 = vmatmul.msk.bf16.gmra.mxu3 %vm554_vm0, %v4056_v58  ;;  %v974_v32 = vadd.f32 %v973_v38, %v824_v5 }
 0x21c   : > { %v1026_v1 = vpop.f32.mrf.mxu2 }
 0x21d   : > { %v1027_v17 = vadd.f32 %v1026_v1, %v877_v34  ;;  %v1228_v19 = vpop.f32.mrf.mxu3  ;;  %v879_v24 = vpop.f32.mrf.mxu1 }
 0x21f   : > { %v4325_v29 = vadd.f32 %v1228_v19, %v1027_v17 }
 0x221   : > { %v976_v44 = vpop.f32.mrf.mxu0 }
 0x222   : > { %v977_v16 = vadd.f32 %v976_v44, %v827_v4 }
 0x224   : > { %v1028_v37 = vpop.f32.mrf.mxu2  ;;  %3320 = vmatmul.msk.bf16.gmra.mxu0 %vm554_vm0, %v4072_v10 }
 0x225   : > { %v1029_v26 = vadd.f32 %v1028_v37, %v879_v24  ;;  %v1230_v40 = vpop.f32.mrf.mxu3  ;;  %v882_v54 = vpop.f32.mrf.mxu1 }
 0x227   : > { %v4329_v56 = vadd.f32 %v1230_v40, %v1029_v26 }
 0x228   : > { %3249 = vmatmul.msk.bf16.gmra.mxu1 %vm554_vm0, %v4072_v10 }
 0x229   : > { %3273 = vmatmul.msk.bf16.gmra.mxu2 %vm554_vm0, %v4070_v9  ;;  %v978_v58 = vpop.f32.mrf.mxu0 }
 0x22a   : > { %3297 = vmatmul.msk.bf16.gmra.mxu3 %vm554_vm0, %v4074_v12  ;;  %v979_v5 = vadd.f32 %v978_v58, %v829_v28  ;;  %v3434_v28 = vld [vmem:[#allocation6 + $0x80] sm:$0xff] }
 0x22b   : > { %2571 = vmatpush.bf16.msra.mxu2 %v3434_v28 }
 0x22c   : > { %v1031_v4 = vpop.f32.mrf.mxu2 }
 0x22d   : > { %v1032_v23 = vadd.f32 %v1031_v4, %v882_v54  ;;  %v1233_v34 = vpop.f32.mrf.mxu3  ;;  %v884_v38 = vpop.f32.mrf.mxu1 }
 0x22f   : > { %v4337_v1 = vadd.f32 %v1233_v34, %v1032_v23  ;;  %v3432_v23 = vld [vmem:[#allocation6 + $0x70] sm:$0xff] }
 0x230   : > { %2337 = vmatpush.bf16.msra.mxu1 %v3432_v23 }
 0x231   : > { %v1168_v17 = vpop.f32.mrf.mxu0 }
 0x232   : > { %v1248_v19 = vadd.f32 %v1168_v17, %v967_v52 }
 0x234   : > { %v1033_v24 = vpop.f32.mrf.mxu2  ;;  %3321 = vmatmul.msk.bf16.gmra.mxu0 %vm554_vm0, %v4090_v31 }
 0x235   : > { %v1034_v44 = vadd.f32 %v1033_v24, %v884_v38  ;;  %v1235_v37 = vpop.f32.mrf.mxu3  ;;  %v887_v9 = vpop.f32.mrf.mxu1 }
 0x237   : > { %v4341_v10 = vadd.f32 %v1235_v37, %v1034_v44 }
 0x238   : > { %3250 = vmatmul.msk.bf16.gmra.mxu1 %vm554_vm0, %v4090_v31 }
 0x239   : > { %3274 = vmatmul.msk.bf16.gmra.mxu2 %vm554_vm0, %v4088_v30  ;;  %v1170_v12 = vpop.f32.mrf.mxu0 }
 0x23a   : > { %3298 = vmatmul.msk.bf16.gmra.mxu3 %vm554_vm0, %v4092_v33  ;;  %v1249_v52 = vadd.f32 %v1170_v12, %v969_v27 }
 0x23c   : > { %v1036_v26 = vpop.f32.mrf.mxu2 }
 0x23d   : > { %v1037_v40 = vadd.f32 %v1036_v26, %v887_v9  ;;  %v1238_v54 = vpop.f32.mrf.mxu3  ;;  %v889_v58 = vpop.f32.mrf.mxu1  ;;  %v3437_v26 = vld [vmem:[%s4845_s5 + $0x8] sm:$0xff] }
 0x23e   : > { %2843 = vmatpush.bf16.msra.mxu3 %v3437_v26 }
 0x23f   : > { %v4349_v4 = vadd.f32 %v1238_v54, %v1037_v40 }
 0x241   : > { %v1173_v34 = vpop.f32.mrf.mxu0 }
 0x242   : > { %v1250_v31 = vadd.f32 %v1173_v34, %v972_v8 }
 0x244   : > { %v1038_v38 = vpop.f32.mrf.mxu2  ;;  %3322 = vmatmul.msk.bf16.gmra.mxu0 %vm554_vm0, %v4108_v59 }
 0x245   : > { %v1039_v17 = vadd.f32 %v1038_v38, %v889_v58  ;;  %v1240_v30 = vpop.f32.mrf.mxu3  ;;  %v892_v33 = vpop.f32.mrf.mxu1 }
 0x247   : > { %v4353_v24 = vadd.f32 %v1240_v30, %v1039_v17 }
 0x248   : > { %3251 = vmatmul.msk.bf16.gmra.mxu1 %vm554_vm0, %v4108_v59 }
 0x249   : > { %3275 = vmatmul.msk.bf16.gmra.mxu2 %vm554_vm0, %v4106_v57  ;;  %v1175_v27 = vpop.f32.mrf.mxu0 }
 0x24a   : > { %3299 = vmatmul.msk.bf16.gmra.mxu3 %vm554_vm0, %v4110_v62  ;;  %v1251_v8 = vadd.f32 %v1175_v27, %v974_v32 }
 0x24c   : > { %v1041_v44 = vpop.f32.mrf.mxu2 }
 0x24d   : > { %v1042_v37 = vadd.f32 %v1041_v44, %v892_v33  ;;  %v1243_v9 = vpop.f32.mrf.mxu3  ;;  %v894_v12 = vpop.f32.mrf.mxu1 }
 0x24f   : > { %v4361_v28 = vadd.f32 %v1243_v9, %v1042_v37 }
 0x251   : > { %v1178_v59 = vpop.f32.mrf.mxu0 }
 0x252   : > { %v1252_v40 = vadd.f32 %v1178_v59, %v977_v16 }
 0x254   : > { %v1043_v54 = vpop.f32.mrf.mxu2  ;;  %3323 = vmatmul.msk.bf16.gmra.mxu0 %vm554_vm0, %v4129_v15 }
 0x255   : > { %v1044_v57 = vadd.f32 %v1043_v54, %v894_v12  ;;  %v1245_v58 = vpop.f32.mrf.mxu3  ;;  %v1402_v62 = vpop.f32.mrf.mxu1 }
 0x256   : > { %v1482_v23 = vadd.f32 %v1402_v62, %v1248_v19 }
 0x257   : > { %v4368_v32 = vadd.f32 %v1245_v58, %v1044_v57 }
 0x258   : > { %3252 = vmatmul.msk.bf16.gmra.mxu1 %vm554_vm0, %v4129_v15 }
 0x259   : > { %3276 = vmatmul.msk.bf16.gmra.mxu2 %vm554_vm0, %v4127_v55  ;;  %v1180_v16 = vpop.f32.mrf.mxu0 }
 0x25a   : > { %3300 = vmatmul.msk.bf16.gmra.mxu3 %vm554_vm0, %v4131_v20  ;;  %v1253_v34 = vadd.f32 %v1180_v16, %v979_v5 }
 0x25c   : > { %v1636_v38 = vpop.f32.mrf.mxu2 }
 0x25d   : > { %v1716_v17 = vadd.f32 %v1636_v38, %v1482_v23  ;;  %v1870_v30 = vpop.f32.mrf.mxu3  ;;  %v1404_v33 = vpop.f32.mrf.mxu1 }
 0x25e   : > { %v1483_v44 = vadd.f32 %v1404_v33, %v1249_v52 }
 0x25f   : > { %v1950_v27 = vadd.f32 %v1870_v30, %v1716_v17 }
 0x261   : > { %v2105_v37 = vpop.f32.mrf.mxu0 }
 0x262   : > { %v4376_v9 = vadd.f32 %v2105_v37, %v1950_v27 }
 0x264   : > { %v1638_v19 = vpop.f32.mrf.mxu2  ;;  %3324 = vmatmul.msk.bf16.gmra.mxu0 %vm554_vm0, %v4149_v43 }
 0x265   : > { %v1717_v12 = vadd.f32 %v1638_v19, %v1483_v44  ;;  %v1872_v15 = vpop.f32.mrf.mxu3  ;;  %v1407_v55 = vpop.f32.mrf.mxu1 }
 0x266   : > { %v1484_v20 = vadd.f32 %v1407_v55, %v1250_v31 }
 0x267   : > { %v1951_v26 = vadd.f32 %v1872_v15, %v1717_v12 }
 0x268   : > { %3253 = vmatmul.msk.bf16.gmra.mxu1 %vm554_vm0, %v4149_v43 }
 0x269   : > { %3277 = vmatmul.msk.bf16.gmra.mxu2 %vm554_vm0, %v4147_v42  ;;  %v2107_v5 = vpop.f32.mrf.mxu0 }
 0x26a   : > { %3301 = vmatmul.msk.bf16.gmra.mxu3 %vm554_vm0, %v4151_v45  ;;  %v4386_v52 = vadd.f32 %v2107_v5, %v1951_v26 }
 0x26c   : > { %v1641_v59 = vpop.f32.mrf.mxu2 }
 0x26d   : > { %v1718_v54 = vadd.f32 %v1641_v59, %v1484_v20  ;;  %v1875_v57 = vpop.f32.mrf.mxu3  ;;  %v1409_v58 = vpop.f32.mrf.mxu1 }
 0x26e   : > { %v1485_v23 = vadd.f32 %v1409_v58, %v1251_v8 }
 0x26f   : > { %v1952_v62 = vadd.f32 %v1875_v57, %v1718_v54 }
 0x271   : > { %v2110_v16 = vpop.f32.mrf.mxu0 }
 0x272   : > { %v4388_v31 = vadd.f32 %v2110_v16, %v1952_v62 }
 0x274   : > { %v1643_v38 = vpop.f32.mrf.mxu2  ;;  %3325 = vmatmul.msk.bf16.gmra.mxu0 %vm554_vm0, %v4166_v7 }
 0x275   : > { %v1719_v43 = vadd.f32 %v1643_v38, %v1485_v23  ;;  %v1877_v17 = vpop.f32.mrf.mxu3  ;;  %v1412_v42 = vpop.f32.mrf.mxu1 }
 0x276   : > { %v1486_v30 = vadd.f32 %v1412_v42, %v1252_v40 }
 0x277   : > { %v1953_v45 = vadd.f32 %v1877_v17, %v1719_v43 }
 0x278   : > { %3254 = vmatmul.msk.bf16.gmra.mxu1 %vm554_vm0, %v4166_v7 }
 0x279   : > { %3278 = vmatmul.msk.bf16.gmra.mxu2 %vm554_vm0, %v4164_v6  ;;  %v2112_v8 = vpop.f32.mrf.mxu0 }
 0x27a   : > { %3302 = vmatmul.msk.bf16.gmra.mxu3 %vm554_vm0, %v4168_v11  ;;  %v4398_v33 = vadd.f32 %v2112_v8, %v1953_v45 }
 0x27c   : > { %v1646_v27 = vpop.f32.mrf.mxu2 }
 0x27d   : > { %v1720_v44 = vadd.f32 %v1646_v27, %v1486_v30  ;;  %v1880_v37 = vpop.f32.mrf.mxu3  ;;  %v1414_v19 = vpop.f32.mrf.mxu1 }
 0x27e   : > { %v1487_v15 = vadd.f32 %v1414_v19, %v1253_v34 }
 0x27f   : > { %v1954_v12 = vadd.f32 %v1880_v37, %v1720_v44 }
 0x281   : > { %v2115_v55 = vpop.f32.mrf.mxu0 }
 0x282   : > { %v4400_v40 = vadd.f32 %v2115_v55, %v1954_v12 }
 0x284   : > { %v1648_v26 = vpop.f32.mrf.mxu2  ;;  %3326 = vmatmul.msk.bf16.gmra.mxu0 %vm554_vm0, %v4190_v61 }
 0x285   : > { %v1721_v7 = vadd.f32 %v1648_v26, %v1487_v15  ;;  %v1882_v20 = vpop.f32.mrf.mxu3  ;;  %v1417_v6 = vpop.f32.mrf.mxu1  ;;  %v4865_v15 = vld [vmem:[#allocation13_spill] sm:$0xff] }
 0x286   : > { %v1488_v5 = vadd.f32 %v1417_v6, %v4178_v25  ;;  %v4866_v6 = vld [vmem:[#allocation12_spill] sm:$0xff] }
 0x287   : > { %v1955_v11 = vadd.f32 %v1882_v20, %v1721_v7 }
 0x288   : > { %3255 = vmatmul.msk.bf16.gmra.mxu1 %vm554_vm0, %v4190_v61 }
 0x289   : > { %3279 = vmatmul.msk.bf16.gmra.mxu2 %vm554_vm0, %v4188_v60  ;;  %v2117_v34 = vpop.f32.mrf.mxu0 }
 0x28a   : > { %3303 = vmatmul.msk.bf16.gmra.mxu3 %vm554_vm0, %v4192_v63  ;;  %v4411_v59 = vadd.f32 %v2117_v34, %v1955_v11 }
 0x28c   : > { %v1651_v54 = vpop.f32.mrf.mxu2 }
 0x28d   : > { %v1722_v57 = vadd.f32 %v1651_v54, %v1488_v5  ;;  %v1885_v58 = vpop.f32.mrf.mxu3  ;;  %v1419_v62 = vpop.f32.mrf.mxu1 }
 0x28e   : > { %v1489_v16 = vadd.f32 %v1419_v62, %v4186_v53 }
 0x28f   : > { %v1956_v23 = vadd.f32 %v1885_v58, %v1722_v57  ;;  %v4868_v57 = vld [vmem:[#allocation16_spill] sm:$0xff]  ;;  %v4869_v58 = vld [vmem:[#allocation17_spill] sm:$0xff] }
 0x291   : > { %v2120_v25 = vpop.f32.mrf.mxu0 }
 0x292   : > { %v4414_v38 = vadd.f32 %v2120_v25, %v1956_v23 }
 0x294   : > { %v1653_v61 = vpop.f32.mrf.mxu2  ;;  %3327 = vmatmul.msk.bf16.gmra.mxu0 %vm554_vm0, %v4214_v51 }
 0x295   : > { %v1723_v43 = vadd.f32 %v1653_v61, %v1489_v16  ;;  %v1887_v17 = vpop.f32.mrf.mxu3  ;;  %v1422_v60 = vpop.f32.mrf.mxu1 }
 0x296   : > { %v1490_v42 = vadd.f32 %v1422_v60, %v4202_v14  ;;  %v2011_v60 = vld [vmem:[#allocation2 + $0x180] sm:$0xff] }
 0x297   : > { %v1957_v63 = vadd.f32 %v1887_v17, %v1723_v43  ;;  %v4870_v43 = vld [vmem:[#allocation15_spill] sm:$0xff] }
 0x298   : > { %3256 = vmatmul.msk.bf16.gmra.mxu1 %vm554_vm0, %v4214_v51 }
 0x299   : > { %3280 = vmatmul.msk.bf16.gmra.mxu2 %vm554_vm0, %v4212_v49  ;;  %v2122_v53 = vpop.f32.mrf.mxu0 }
 0x29a   : > { %3304 = vmatmul.msk.bf16.gmra.mxu3 %vm554_vm0, %v4216_v50  ;;  %v4425_v45 = vadd.f32 %v2122_v53, %v1957_v63  ;;  %v2012_v63 = vld [vmem:[#allocation2 + $0x188] sm:$0xff] }
 0x29c   : > { %v1656_v30 = vpop.f32.mrf.mxu2 }
 0x29d   : > { %v1724_v8 = vadd.f32 %v1656_v30, %v1490_v42  ;;  %v1890_v27 = vpop.f32.mrf.mxu3  ;;  %v1424_v44 = vpop.f32.mrf.mxu1  ;;  %v2029_v42 = vpack.c.bf16 %v2012_v63, %v2011_v60  ;;  %v1544_v30 = vld [vmem:[#allocation2 + $0x181] sm:$0xff] }
 0x29e   : > { %v1491_v14 = vadd.f32 %v1424_v44, %v4210_v48  ;;  %v1778_v44 = vld [vmem:[#allocation2 + $0x182] sm:$0xff] }
 0x29f   : > { %v4427_v37 = vadd.f32 %v1890_v27, %v1724_v8 }
 0x2a4   : > { %v1658_v19 = vpop.f32.mrf.mxu2  ;;  %3328 = vmatmul.msk.bf16.gmra.mxu0 %vm554_vm0, %v4235_v3 }
 0x2a5   : > { %v4430_v12 = vadd.f32 %v1658_v19, %v1491_v14  ;;  %v4432_v51 = vpop.f32.mrf.mxu3  ;;  %v1427_v49 = vpop.f32.mrf.mxu1  ;;  %v1779_v14 = vld [vmem:[#allocation2 + $0x18a] sm:$0xff] }
 0x2a6   : > { %v1492_v50 = vadd.f32 %v1427_v49, %v4226_v22 }
 0x2a8   : > { %3257 = vmatmul.msk.bf16.gmra.mxu1 %vm554_vm0, %v4235_v3  ;;  %v4867_v3 = vld [vmem:[#allocation14_spill] sm:$0xff] }
 0x2a9   : > { %3281 = vmatmul.msk.bf16.gmra.mxu2 %vm554_vm0, %v4233_v2 }
 0x2aa   : > { %3305 = vmatmul.msk.bf16.gmra.mxu3 %vm554_vm0, %v4865_v15  ;;  %v4470_v15 = vpack.c.bf16 %v1779_v14, %v1778_v44 }
 0x2ac   : > { %v1661_v48 = vpop.f32.mrf.mxu2 }
 0x2ad   : > { %v1726_v55 = vadd.f32 %v1661_v48, %v1492_v50  ;;  %v1895_v26 = vpop.f32.mrf.mxu3  ;;  %v1429_v7 = vpop.f32.mrf.mxu1 }
 0x2ae   : > { %v1493_v11 = vadd.f32 %v1429_v7, %v4866_v6  ;;  %v2013_v6 = vld [vmem:[#allocation2 + $0x198] sm:$0xff] }
 0x2af   : > { %v4443_v20 = vadd.f32 %v1895_v26, %v1726_v55 }
 0x2b4   : > { %v1663_v5 = vpop.f32.mrf.mxu2  ;;  %3329 = vmatmul.msk.bf16.gmra.mxu0 %vm554_vm0, %v4256_v47 }
 0x2b5   : > { %v4446_v34 = vadd.f32 %v1663_v5, %v1493_v11  ;;  %v4448_v22 = vpop.f32.mrf.mxu3  ;;  %v1432_v2 = vpop.f32.mrf.mxu1  ;;  %v2014_v11 = vld [vmem:[#allocation2 + $0x1a0] sm:$0xff] }
 0x2b6   : > { %v1494_v54 = vadd.f32 %v1432_v2, %v4867_v3  ;;  %v3436_v2 = vld [vmem:[%s4845_s5] sm:$0xff]  ;;  %v2030_v3 = vpack.c.bf16 %v2014_v11, %v2013_v6 }
 0x2b7   : > { %2844 = vmatpush.bf16.msra.mxu3 %v3436_v2 }
 0x2b8   : > { %3258 = vmatmul.msk.bf16.gmra.mxu1 %vm554_vm0, %v4256_v47  ;;  %v1545_v47 = vld [vmem:[#allocation2 + $0x189] sm:$0xff] }
 0x2b9   : > { %3282 = vmatmul.msk.bf16.gmra.mxu2 %vm554_vm0, %v4868_v57  ;;  %v4468_v50 = vpack.c.bf16 %v1545_v47, %v1544_v30  ;;  %v2218_v57 = vld [vmem:[#allocation2 + $0x39] sm:$0xff] }
 0x2ba   : > { %3306 = vmatmul.msk.bf16.gmra.mxu3 %vm554_vm0, %v4869_v58  ;;  %v2451_v58 = vld [vmem:[#allocation2 + $0x32] sm:$0xff] }
 0x2bc   : > { %v1666_v62 = vpop.f32.mrf.mxu2 }
 0x2bd   : > { %v1728_v23 = vadd.f32 %v1666_v62, %v1494_v54  ;;  %v1900_v16 = vpop.f32.mrf.mxu3  ;;  %v1434_v25 = vpop.f32.mrf.mxu1  ;;  %v2452_v62 = vld [vmem:[#allocation2 + $0x3a] sm:$0xff] }
 0x2be   : > { %v1495_v17 = vadd.f32 %v1434_v25, %v4870_v43  ;;  %v2217_v43 = vld [vmem:[#allocation2 + $0x31] sm:$0xff]  ;;  %v2483_v60 = vpack.c.bf16 %v2452_v62, %v2451_v58 }
 0x2bf   : > { %v4459_v61 = vadd.f32 %v1900_v16, %v1728_v23 }
 0x2c4   : > { %v1668_v53 = vpop.f32.mrf.mxu2  ;;  %3330 = vmatmul.msk.bf16.gmra.mxu0 %vm554_vm0, %v2029_v42 }
 0x2c5   : > { %v4462_v8 = vadd.f32 %v1668_v53, %v1495_v17  ;;  %v4464_v27 = vpop.f32.mrf.mxu3  ;;  %v1437_v19 = vpop.f32.mrf.mxu1  ;;  %v2249_v17 = vpack.c.bf16 %v2218_v57, %v2217_v43  ;;  %v2455_v43 = vld [vmem:[#allocation2 + $0x62] sm:$0xff] }
 0x2c6   : > { %v1496_v49 = vadd.f32 %v1437_v19, %v4268_v13  ;;  %v2220_v19 = vld [vmem:[#allocation2 + $0x51] sm:$0xff] }
 0x2c8   : > { %3259 = vmatmul.msk.bf16.gmra.mxu1 %vm554_vm0, %v2029_v42 }
 0x2c9   : > { %3283 = vmatmul.msk.bf16.gmra.mxu2 %vm554_vm0, %v4468_v50 }
 0x2ca   : > { %3307 = vmatmul.msk.bf16.gmra.mxu3 %vm554_vm0, %v4470_v15 }
 0x2cc   : > { %v1671_v48 = vpop.f32.mrf.mxu2 }
 0x2cd   : > { %v1730_v55 = vadd.f32 %v1671_v48, %v1496_v49  ;;  %v1905_v26 = vpop.f32.mrf.mxu3  ;;  %v1439_v7 = vpop.f32.mrf.mxu1  ;;  %v2453_v49 = vld [vmem:[#allocation2 + $0x4a] sm:$0xff]  ;;  %v2454_v48 = vld [vmem:[#allocation2 + $0x52] sm:$0xff] }
 0x2ce   : > { %v1497_v13 = vadd.f32 %v1439_v7, %v4271_v35  ;;  %v2219_v7 = vld [vmem:[#allocation2 + $0x49] sm:$0xff] }
 0x2cf   : > { %v4477_v5 = vadd.f32 %v1905_v26, %v1730_v55  ;;  %v2250_v11 = vpack.c.bf16 %v2220_v19, %v2219_v7 }
 0x2d4   : > { %v1673_v54 = vpop.f32.mrf.mxu2  ;;  %3331 = vmatmul.msk.bf16.gmra.mxu0 %vm554_vm0, %v2030_v3 }
 0x2d5   : > { %v4483_v23 = vadd.f32 %v1673_v54, %v1497_v13  ;;  %v4485_v16 = vpop.f32.mrf.mxu3  ;;  %v1442_v25 = vpop.f32.mrf.mxu1  ;;  %v2484_v13 = vpack.c.bf16 %v2454_v48, %v2453_v49  ;;  %v4871_v48 = vld [vmem:[#allocation18_spill] sm:$0xff] }
 0x2d6   : > { %v1498_v35 = vadd.f32 %v1442_v25, %v4278_v21  ;;  %v2222_v25 = vld [vmem:[#allocation2 + $0x69] sm:$0xff] }
 0x2d8   : > { %3340 = vmatmul.msk.bf16.vlgmr.msra.gmra.mxu1 %vm554_vm0, %v2249_v17 }
 0x2d9   : > { %3364 = vmatmul.msk.bf16.vlgmr.msra.gmra.mxu2 %vm554_vm0, %v2483_v60 }
 0x2dc   : > { %v1676_v63 = vpop.f32.mrf.mxu2 }
 0x2dd   : > { %v1732_v42 = vadd.f32 %v1676_v63, %v1498_v35  ;;  %v1910_v53 = vpop.f32.mrf.mxu3  ;;  %v1444_v30 = vpop.f32.mrf.mxu1  ;;  %v2456_v35 = vld [vmem:[#allocation2 + $0x6a] sm:$0xff]  ;;  %v2221_v63 = vld [vmem:[#allocation2 + $0x61] sm:$0xff] }
 0x2de   : > { %v1499_v44 = vadd.f32 %v1444_v30, %v4282_v41  ;;  %v2485_v30 = vpack.c.bf16 %v2456_v35, %v2455_v43 }
 0x2df   : > { %v4491_v47 = vadd.f32 %v1910_v53, %v1732_v42  ;;  %v2251_v53 = vpack.c.bf16 %v2222_v25, %v2221_v63 }
 0x2e4   : > { %v1678_v14 = vpop.f32.mrf.mxu2 }
 0x2e5   : > { %v4494_v55 = vadd.f32 %v1678_v14, %v1499_v44  ;;  %v4496_v21 = vpop.f32.mrf.mxu3  ;;  %v1447_v26 = vpop.f32.mrf.mxu1 }
 0x2e6   : > { %v1500_v6 = vadd.f32 %v1447_v26, %v4289_v0 }
 0x2e8   : > { %3341 = vmatmul.msk.bf16.gmra.mxu1 %vm554_vm0, %v2250_v11  ;;  %v2457_v11 = vld [vmem:[#allocation2 + $0x7a] sm:$0xff] }
 0x2e9   : > { %3365 = vmatmul.msk.bf16.gmra.mxu2 %vm554_vm0, %v2484_v13  ;;  %v2458_v13 = vld [vmem:[#allocation2 + $0x82] sm:$0xff] }
 0x2ec   : > { %v1681_v2 = vpop.f32.mrf.mxu2 }
 0x2ed   : > { %v1734_v41 = vadd.f32 %v1681_v2, %v1500_v6  ;;  %v1915_v3 = vpop.f32.mrf.mxu3  ;;  %v1449_v54 = vpop.f32.mrf.mxu1  ;;  %v2224_v6 = vld [vmem:[#allocation2 + $0x81] sm:$0xff] }
 0x2ee   : > { %v1501_v58 = vadd.f32 %v1449_v54, %v4293_v46 }
 0x2ef   : > { %v4501_v57 = vadd.f32 %v1915_v3, %v1734_v41  ;;  %v2223_v3 = vld [vmem:[#allocation2 + $0x79] sm:$0xff] }
 0x2f4   : > { %v1683_v62 = vpop.f32.mrf.mxu2 }
 0x2f5   : > { %v4504_v17 = vadd.f32 %v1683_v62, %v1501_v58  ;;  %v4506_v0 = vpop.f32.mrf.mxu3  ;;  %v1452_v60 = vpop.f32.mrf.mxu1  ;;  %v2252_v58 = vpack.c.bf16 %v2224_v6, %v2223_v3  ;;  %v2486_v62 = vpack.c.bf16 %v2458_v13, %v2457_v11 }
 0x2f6   : > { %v1502_v42 = vadd.f32 %v1452_v60, %v4301_v39 }
 0x2f8   : > { %3342 = vmatmul.msk.bf16.gmra.mxu1 %vm554_vm0, %v2251_v53 }
 0x2f9   : > { %3366 = vmatmul.msk.bf16.gmra.mxu2 %vm554_vm0, %v2485_v30  ;;  %v2226_v30 = vld [vmem:[#allocation2 + $0x99] sm:$0xff] }
 0x2fc   : > { %v1686_v44 = vpop.f32.mrf.mxu2 }
 0x2fd   : > { %v1736_v46 = vadd.f32 %v1686_v44, %v1502_v42  ;;  %v1920_v14 = vpop.f32.mrf.mxu3  ;;  %v1454_v19 = vpop.f32.mrf.mxu1  ;;  %v2459_v44 = vld [vmem:[#allocation2 + $0x92] sm:$0xff] }
 0x2fe   : > { %v1503_v26 = vadd.f32 %v1454_v19, %v4871_v48  ;;  %v2225_v48 = vld [vmem:[#allocation2 + $0x91] sm:$0xff] }
 0x2ff   : > { %v4511_v49 = vadd.f32 %v1920_v14, %v1736_v46  ;;  %v2460_v46 = vld [vmem:[#allocation2 + $0x9a] sm:$0xff] }
 0x300   : > { %v2487_v6 = vpack.c.bf16 %v2460_v46, %v2459_v44 }
 0x304   : > { %v1688_v7 = vpop.f32.mrf.mxu2 }
 0x305   : > { %v4514_v2 = vadd.f32 %v1688_v7, %v1503_v26  ;;  %v4516_v39 = vpop.f32.mrf.mxu3  ;;  %v1457_v41 = vpop.f32.mrf.mxu1  ;;  %v2253_v7 = vpack.c.bf16 %v2226_v30, %v2225_v48 }
 0x306   : > { %v1504_v54 = vadd.f32 %v1457_v41, %v4313_v18 }
 0x308   : > { %3343 = vmatmul.msk.bf16.gmra.mxu1 %vm554_vm0, %v2252_v58 }
 0x309   : > { %3367 = vmatmul.msk.bf16.gmra.mxu2 %vm554_vm0, %v2486_v62  ;;  %v2228_v62 = vld [vmem:[#allocation2 + $0xb1] sm:$0xff] }
 0x30c   : > { %v1691_v25 = vpop.f32.mrf.mxu2 }
 0x30d   : > { %v1738_v43 = vadd.f32 %v1691_v25, %v1504_v54  ;;  %v1925_v35 = vpop.f32.mrf.mxu3  ;;  %v1459_v60 = vpop.f32.mrf.mxu1  ;;  %v2461_v25 = vld [vmem:[#allocation2 + $0xaa] sm:$0xff] }
 0x30e   : > { %v1505_v42 = vadd.f32 %v1459_v60, %v4317_v36 }
 0x30f   : > { %v4521_v63 = vadd.f32 %v1925_v35, %v1738_v43  ;;  %v2462_v43 = vld [vmem:[#allocation2 + $0xb2] sm:$0xff] }
 0x310   : > { %v2488_v44 = vpack.c.bf16 %v2462_v43, %v2461_v25 }
 0x314   : > { %v1693_v53 = vpop.f32.mrf.mxu2 }
 0x315   : > { %v4524_v14 = vadd.f32 %v1693_v53, %v1505_v42  ;;  %v4526_v18 = vpop.f32.mrf.mxu3  ;;  %v1462_v19 = vpop.f32.mrf.mxu1  ;;  %v2227_v42 = vld [vmem:[#allocation2 + $0xa9] sm:$0xff] }
 0x316   : > { %v1506_v26 = vadd.f32 %v1462_v19, %v4325_v29  ;;  %v2254_v30 = vpack.c.bf16 %v2228_v62, %v2227_v42 }
 0x318   : > { %3344 = vmatmul.msk.bf16.gmra.mxu1 %vm554_vm0, %v2253_v7 }
 0x319   : > { %3368 = vmatmul.msk.bf16.gmra.mxu2 %vm554_vm0, %v2487_v6 }
 0x31c   : > { %v1696_v11 = vpop.f32.mrf.mxu2 }
 0x31d   : > { %v1740_v36 = vadd.f32 %v1696_v11, %v1506_v26  ;;  %v1930_v13 = vpop.f32.mrf.mxu3  ;;  %v1464_v41 = vpop.f32.mrf.mxu1  ;;  %v2230_v11 = vld [vmem:[#allocation2 + $0xc9] sm:$0xff] }
 0x31e   : > { %v1507_v54 = vadd.f32 %v1464_v41, %v4329_v56 }
 0x31f   : > { %v4531_v3 = vadd.f32 %v1930_v13, %v1740_v36  ;;  %v2463_v36 = vld [vmem:[#allocation2 + $0xc2] sm:$0xff]  ;;  %v2464_v13 = vld [vmem:[#allocation2 + $0xca] sm:$0xff] }
 0x320   : > { %v2489_v43 = vpack.c.bf16 %v2464_v13, %v2463_v36 }
 0x324   : > { %v1698_v58 = vpop.f32.mrf.mxu2 }
 0x325   : > { %v4534_v35 = vadd.f32 %v1698_v58, %v1507_v54  ;;  %v4536_v29 = vpop.f32.mrf.mxu3  ;;  %v1467_v60 = vpop.f32.mrf.mxu1  ;;  %v2229_v58 = vld [vmem:[#allocation2 + $0xc1] sm:$0xff] }
 0x326   : > { %v1508_v53 = vadd.f32 %v1467_v60, %v4337_v1  ;;  %v2255_v25 = vpack.c.bf16 %v2230_v11, %v2229_v58  ;;  %v2231_v11 = vld [vmem:[#allocation2 + $0xd9] sm:$0xff] }
 0x328   : > { %3345 = vmatmul.msk.bf16.gmra.mxu1 %vm554_vm0, %v2254_v30 }
 0x329   : > { %3369 = vmatmul.msk.bf16.gmra.mxu2 %vm554_vm0, %v2488_v44 }
 0x32c   : > { %v1701_v46 = vpop.f32.mrf.mxu2 }
 0x32d   : > { %v1742_v56 = vadd.f32 %v1701_v46, %v1508_v53  ;;  %v1935_v19 = vpop.f32.mrf.mxu3  ;;  %v1469_v48 = vpop.f32.mrf.mxu1 }
 0x32e   : > { %v1509_v7 = vadd.f32 %v1469_v48, %v4341_v10  ;;  %v2466_v48 = vld [vmem:[#allocation2 + $0xe2] sm:$0xff] }
 0x32f   : > { %v4541_v26 = vadd.f32 %v1935_v19, %v1742_v56  ;;  %v2232_v56 = vld [vmem:[#allocation2 + $0xe1] sm:$0xff] }
 0x330   : > { %v2465_v19 = vld [vmem:[#allocation2 + $0xda] sm:$0xff]  ;;  %v2256_v13 = vpack.c.bf16 %v2232_v56, %v2231_v11  ;;  %v2233_v56 = vld [vmem:[#allocation2 + $0xf1] sm:$0xff] }
 0x334   : > { %v1703_v6 = vpop.f32.mrf.mxu2 }
 0x335   : > { %v4544_v41 = vadd.f32 %v1703_v6, %v1509_v7  ;;  %v4546_v1 = vpop.f32.mrf.mxu3  ;;  %v1472_v54 = vpop.f32.mrf.mxu1 }
 0x336   : > { %v1510_v62 = vadd.f32 %v1472_v54, %v4349_v4  ;;  %v2490_v54 = vpack.c.bf16 %v2466_v48, %v2465_v19 }
 0x338   : > { %3346 = vmatmul.msk.bf16.gmra.mxu1 %vm554_vm0, %v2255_v25 }
 0x339   : > { %3370 = vmatmul.msk.bf16.gmra.mxu2 %vm554_vm0, %v2489_v43 }
 0x33c   : > { %v1706_v60 = vpop.f32.mrf.mxu2 }
 0x33d   : > { %v1744_v10 = vadd.f32 %v1706_v60, %v1510_v62  ;;  %v1940_v42 = vpop.f32.mrf.mxu3  ;;  %v1474_v53 = vpop.f32.mrf.mxu1 }
 0x33e   : > { %v1511_v44 = vadd.f32 %v1474_v53, %v4353_v24  ;;  %v2467_v53 = vld [vmem:[#allocation2 + $0xf2] sm:$0xff] }
 0x33f   : > { %v4551_v30 = vadd.f32 %v1940_v42, %v1744_v10  ;;  %v2234_v42 = vld [vmem:[#allocation2 + $0xf9] sm:$0xff] }
 0x340   : > { %v2257_v19 = vpack.c.bf16 %v2234_v42, %v2233_v56  ;;  %v4577_v56 = vpop.f32.mrf.mxu0 }
 0x344   : > { %v1708_v46 = vpop.f32.mrf.mxu2 }
 0x345   : > { %v4554_v7 = vadd.f32 %v1708_v46, %v1511_v44  ;;  %v4556_v4 = vpop.f32.mrf.mxu3  ;;  %v1477_v6 = vpop.f32.mrf.mxu1  ;;  %v2468_v44 = vld [vmem:[#allocation2 + $0xfa] sm:$0xff] }
 0x346   : > { %v1512_v36 = vadd.f32 %v1477_v6, %v4361_v28  ;;  %v2491_v48 = vpack.c.bf16 %v2468_v44, %v2467_v53  ;;  %v2235_v53 = vld [vmem:[#allocation2 + $0x109] sm:$0xff] }
 0x348   : > { %3347 = vmatmul.msk.bf16.gmra.mxu1 %vm554_vm0, %v2256_v13 }
 0x349   : > { %3371 = vmatmul.msk.bf16.gmra.mxu2 %vm554_vm0, %v2490_v54 }
 0x34c   : > { %v1711_v58 = vpop.f32.mrf.mxu2 }
 0x34d   : > { %v1746_v24 = vadd.f32 %v1711_v58, %v1512_v36  ;;  %v1945_v62 = vpop.f32.mrf.mxu3  ;;  %v1479_v25 = vpop.f32.mrf.mxu1 }
 0x34e   : > { %v1513_v60 = vadd.f32 %v1479_v25, %v4368_v32  ;;  %v4572_v32 = vld [vmem:[%s4844_s4] ss:$0 sm:$0xff]  ;;  %v2470_v25 = vld [vmem:[#allocation2 + $0x112] sm:$0xff] }
 0x34f   : > { %v4561_v43 = vadd.f32 %v1945_v62, %v1746_v24  ;;  %v2236_v24 = vld [vmem:[#allocation2 + $0x111] sm:$0xff] }
 0x350   : > { %v2469_v62 = vld [vmem:[#allocation2 + $0x10a] sm:$0xff] }
 0x354   : > { %v1713_v10 = vpop.f32.mrf.mxu2 }
 0x355   : > { %v4564_v46 = vadd.f32 %v1713_v10, %v1513_v60  ;;  %v2339_v28 = vpop.f32.mrf.mxu1 }
 0x356   : > { %v2419_v36 = vadd.f32 %v2339_v28, %v4376_v9  ;;  %v2258_v9 = vpack.c.bf16 %v2236_v24, %v2235_v53  ;;  %v2492_v28 = vpack.c.bf16 %v2470_v25, %v2469_v62  ;;  %v2238_v62 = vld [vmem:[#allocation2 + $0x129] sm:$0xff] }
 0x357   : > { %v2471_v25 = vld [vmem:[#allocation2 + $0x122] sm:$0xff] }
 0x358   : > { %3348 = vmatmul.msk.bf16.gmra.mxu1 %vm554_vm0, %v2257_v19 }
 0x359   : > { %3372 = vmatmul.msk.bf16.gmra.mxu2 %vm554_vm0, %v2491_v48 }
 0x35c   : > { %v2573_v6 = vpop.f32.mrf.mxu2 }
 0x35d   : > { %v2341_v11 = vpop.f32.mrf.mxu1  ;;  %v2653_v13 = vadd.f32 %v2573_v6, %v2419_v36 }
 0x35e   : > { %v2420_v54 = vadd.f32 %v2341_v11, %v4386_v52 }
 0x35f   : > { %v2689_v60 = vadd.f32 %v4572_v32, %v2653_v13 }
 0x361   : > { %v2721_v19 = vmax.f32 %v2689_v60, 0.0  ;;  %v2472_v60 = vld [vmem:[#allocation2 + $0x12a] sm:$0xff] }
 0x364   : > { %v2575_v58 = vpop.f32.mrf.mxu2 }
 0x365   : > { %v2654_v10 = vadd.f32 %v2575_v58, %v2420_v54  ;;  %v2344_v42 = vpop.f32.mrf.mxu1  ;;  %v4583_v54 = vpop.f32.mrf.mxu0 }
 0x366   : > { %v2421_v36 = vadd.f32 %v2344_v42, %v4388_v31 }
 0x367   : > { %v2690_v44 = vadd.f32 %v4572_v32, %v2654_v10 }
 0x368   : > { %3349 = vmatmul.msk.bf16.gmra.mxu1 %vm554_vm0, %v2258_v9  ;;  %v2237_v9 = vld [vmem:[#allocation2 + $0x121] sm:$0xff] }
 0x369   : > { %v2722_v48 = vmax.f32 %v2690_v44, 0.0  ;;  %3373 = vmatmul.msk.bf16.gmra.mxu2 %vm554_vm0, %v2492_v28 }
 0x36b   : > { %v2753_v52 = vpack.c.bf16 %v2722_v48, %v2721_v19  ;;  %v2259_v19 = vpack.c.bf16 %v2238_v62, %v2237_v9  ;;  %v2493_v48 = vpack.c.bf16 %v2472_v60, %v2471_v25  ;;  %v2240_v62 = vld [vmem:[#allocation2 + $0x141] sm:$0xff] }
 0x36c   : > { %v2578_v6 = vpop.f32.mrf.mxu2  ;;  %v2473_v25 = vld [vmem:[#allocation2 + $0x13a] sm:$0xff]  ;;  %v2474_v60 = vld [vmem:[#allocation2 + $0x142] sm:$0xff] }
 0x36d   : > { %3388 = vmatmul.msk.bf16.vlgmr.msra.gmra.mxu3 %vm554_vm0, %v2753_v52  ;;  %v2346_v11 = vpop.f32.mrf.mxu1  ;;  %v2655_v13 = vadd.f32 %v2578_v6, %v2421_v36  ;;  %v4590_v42 = vpop.f32.mrf.mxu0 }
 0x36e   : > { %v2422_v58 = vadd.f32 %v2346_v11, %v4398_v33 }
 0x36f   : > { %v2691_v10 = vadd.f32 %v4572_v32, %v2655_v13 }
 0x371   : > { %v2723_v52 = vmax.f32 %v2691_v10, 0.0 }
 0x374   : > { %v2580_v24 = vpop.f32.mrf.mxu2 }
 0x375   : > { %v2656_v53 = vadd.f32 %v2580_v24, %v2422_v58  ;;  %v2349_v44 = vpop.f32.mrf.mxu1  ;;  %v4596_v9 = vpop.f32.mrf.mxu0 }
 0x376   : > { %v2423_v36 = vadd.f32 %v2349_v44, %v4400_v40 }
 0x377   : > { %v2692_v28 = vadd.f32 %v4572_v32, %v2656_v53 }
 0x378   : > { %3350 = vmatmul.msk.bf16.gmra.mxu1 %vm554_vm0, %v2259_v19  ;;  %v2239_v19 = vld [vmem:[#allocation2 + $0x139] sm:$0xff] }
 0x379   : > { %v2724_v31 = vmax.f32 %v2692_v28, 0.0  ;;  %3374 = vmatmul.msk.bf16.gmra.mxu2 %vm554_vm0, %v2493_v48 }
 0x37b   : > { %v2754_v33 = vpack.c.bf16 %v2724_v31, %v2723_v52  ;;  %v2260_v52 = vpack.c.bf16 %v2240_v62, %v2239_v19  ;;  %v2494_v31 = vpack.c.bf16 %v2474_v60, %v2473_v25  ;;  %v2242_v62 = vld [vmem:[#allocation2 + $0x159] sm:$0xff] }
 0x37c   : > { %v2583_v6 = vpop.f32.mrf.mxu2  ;;  %v2475_v25 = vld [vmem:[#allocation2 + $0x152] sm:$0xff]  ;;  %v2476_v60 = vld [vmem:[#allocation2 + $0x15a] sm:$0xff] }
 0x37d   : > { %3389 = vmatmul.msk.bf16.gmra.mxu3 %vm554_vm0, %v2754_v33  ;;  %v2351_v11 = vpop.f32.mrf.mxu1  ;;  %v2657_v13 = vadd.f32 %v2583_v6, %v2423_v36  ;;  %v4603_v36 = vpop.f32.mrf.mxu0 }
 0x37e   : > { %v2424_v58 = vadd.f32 %v2351_v11, %v4411_v59 }
 0x37f   : > { %v2693_v10 = vadd.f32 %v4572_v32, %v2657_v13 }
 0x381   : > { %v2725_v33 = vmax.f32 %v2693_v10, 0.0 }
 0x384   : > { %v2585_v24 = vpop.f32.mrf.mxu2 }
 0x385   : > { %v2658_v53 = vadd.f32 %v2585_v24, %v2424_v58  ;;  %v2354_v28 = vpop.f32.mrf.mxu1 }
 0x386   : > { %v2425_v11 = vadd.f32 %v2354_v28, %v4414_v38 }
 0x387   : > { %v2694_v48 = vadd.f32 %v4572_v32, %v2658_v53 }
 0x388   : > { %3351 = vmatmul.msk.bf16.gmra.mxu1 %vm554_vm0, %v2260_v52 }
 0x389   : > { %v2726_v40 = vmax.f32 %v2694_v48, 0.0  ;;  %3375 = vmatmul.msk.bf16.gmra.mxu2 %vm554_vm0, %v2494_v31  ;;  %v2241_v48 = vld [vmem:[#allocation2 + $0x151] sm:$0xff] }
 0x38a   : > { %v2261_v31 = vpack.c.bf16 %v2242_v62, %v2241_v48  ;;  %v2478_v48 = vld [vmem:[#allocation2 + $0x172] sm:$0xff] }
 0x38b   : > { %v2755_v59 = vpack.c.bf16 %v2726_v40, %v2725_v33  ;;  %v2495_v33 = vpack.c.bf16 %v2476_v60, %v2475_v25 }
 0x38c   : > { %v2588_v44 = vpop.f32.mrf.mxu2 }
 0x38d   : > { %3390 = vmatmul.msk.bf16.gmra.mxu3 %vm554_vm0, %v2755_v59  ;;  %v2356_v6 = vpop.f32.mrf.mxu1  ;;  %v2659_v13 = vadd.f32 %v2588_v44, %v2425_v11  ;;  %v2193_v44 = vadd.f32 %v4577_v56, %v4427_v37  ;;  %v1959_v11 = vadd.f32 %v4432_v51, %v4430_v12 }
 0x38e   : > { %v2426_v58 = vadd.f32 %v2356_v6, %v4425_v45  ;;  %v2137_v45 = vpop.f32.mrf.mxu0 }
 0x38f   : > { %v2695_v10 = vadd.f32 %v4572_v32, %v2659_v13 }
 0x391   : > { %v2727_v40 = vmax.f32 %v2695_v10, 0.0  ;;  %v2244_v10 = vld [vmem:[#allocation2 + $0x171] sm:$0xff] }
 0x394   : > { %v2590_v24 = vpop.f32.mrf.mxu2 }
 0x395   : > { %v2660_v53 = vadd.f32 %v2590_v24, %v2426_v58  ;;  %v2359_v19 = vpop.f32.mrf.mxu1  ;;  %v2194_v58 = vadd.f32 %v4583_v54, %v1959_v11 }
 0x396   : > { %v2427_v13 = vadd.f32 %v2359_v19, %v2193_v44  ;;  %v4616_v25 = vpop.f32.mrf.mxu0 }
 0x397   : > { %v2696_v52 = vadd.f32 %v4572_v32, %v2660_v53  ;;  %v2477_v53 = vld [vmem:[#allocation2 + $0x16a] sm:$0xff] }
 0x398   : > { %3352 = vmatmul.msk.bf16.gmra.mxu1 %vm554_vm0, %v2261_v31  ;;  %v2243_v31 = vld [vmem:[#allocation2 + $0x169] sm:$0xff]  ;;  %v2496_v12 = vpack.c.bf16 %v2478_v48, %v2477_v53 }
 0x399   : > { %v2728_v38 = vmax.f32 %v2696_v52, 0.0  ;;  %3376 = vmatmul.msk.bf16.gmra.mxu2 %vm554_vm0, %v2495_v33 }
 0x39b   : > { %v2756_v28 = vpack.c.bf16 %v2728_v38, %v2727_v40  ;;  %v2262_v40 = vpack.c.bf16 %v2244_v10, %v2243_v31 }
 0x39c   : > { %v2593_v59 = vpop.f32.mrf.mxu2 }
 0x39d   : > { %3391 = vmatmul.msk.bf16.gmra.mxu3 %vm554_vm0, %v2756_v28  ;;  %v2361_v6 = vpop.f32.mrf.mxu1  ;;  %v2661_v24 = vadd.f32 %v2593_v59, %v2427_v13  ;;  %v2195_v28 = vadd.f32 %v4590_v42, %v4443_v20 }
 0x39e   : > { %v2428_v62 = vadd.f32 %v2361_v6, %v2194_v58  ;;  %v2142_v59 = vpop.f32.mrf.mxu0  ;;  %v1961_v6 = vadd.f32 %v4448_v22, %v4446_v34 }
 0x39f   : > { %v2697_v52 = vadd.f32 %v4572_v32, %v2661_v24 }
 0x3a0   : > { %v2196_v13 = vadd.f32 %v4596_v9, %v1961_v6  ;;  %v2197_v9 = vadd.f32 %v4603_v36, %v4459_v61 }
 0x3a1   : > { %v2729_v51 = vmax.f32 %v2697_v52, 0.0 }
 0x3a4   : > { %v2595_v60 = vpop.f32.mrf.mxu2 }
 0x3a5   : > { %v2662_v37 = vadd.f32 %v2595_v60, %v2428_v62  ;;  %v2364_v56 = vpop.f32.mrf.mxu1 }
 0x3a6   : > { %v2429_v11 = vadd.f32 %v2364_v56, %v2195_v28  ;;  %v2145_v20 = vpop.f32.mrf.mxu0  ;;  %v1963_v56 = vadd.f32 %v4464_v27, %v4462_v8 }
 0x3a7   : > { %v2698_v33 = vadd.f32 %v4572_v32, %v2662_v37 }
 0x3a8   : > { %3353 = vmatmul.msk.bf16.gmra.mxu1 %vm554_vm0, %v2262_v40 }
 0x3a9   : > { %v2730_v19 = vmax.f32 %v2698_v33, 0.0  ;;  %3377 = vmatmul.msk.bf16.gmra.mxu2 %vm554_vm0, %v2496_v12  ;;  %v2198_v33 = vadd.f32 %v2137_v45, %v1963_v56  ;;  %v2247_v12 = vld [vmem:[#allocation2 + $0x199] sm:$0xff] }
 0x3ab   : > { %v2757_v54 = vpack.c.bf16 %v2730_v19, %v2729_v51  ;;  %v2481_v19 = vld [vmem:[#allocation2 + $0x19a] sm:$0xff] }
 0x3ac   : > { %v2598_v38 = vpop.f32.mrf.mxu2 }
 0x3ad   : > { %3392 = vmatmul.msk.bf16.gmra.mxu3 %vm554_vm0, %v2757_v54  ;;  %v2366_v44 = vpop.f32.mrf.mxu1  ;;  %v2663_v58 = vadd.f32 %v2598_v38, %v2429_v11  ;;  %v2482_v54 = vld [vmem:[#allocation2 + $0x1a2] sm:$0xff] }
 0x3ae   : > { %v2430_v24 = vadd.f32 %v2366_v44, %v2196_v13  ;;  %v2147_v51 = vpop.f32.mrf.mxu0  ;;  %v2498_v36 = vpack.c.bf16 %v2482_v54, %v2481_v19 }
 0x3af   : > { %v2699_v60 = vadd.f32 %v4572_v32, %v2663_v58 }
 0x3b1   : > { %v2731_v42 = vmax.f32 %v2699_v60, 0.0  ;;  %v1965_v60 = vadd.f32 %v4485_v16, %v4483_v23  ;;  %v1967_v16 = vadd.f32 %v4496_v21, %v4494_v55 }
 0x3b4   : > { %v2600_v62 = vpop.f32.mrf.mxu2 }
 0x3b5   : > { %v2664_v10 = vadd.f32 %v2600_v62, %v2430_v24  ;;  %v2369_v53 = vpop.f32.mrf.mxu1  ;;  %v2199_v24 = vadd.f32 %v4616_v25, %v4477_v5 }
 0x3b6   : > { %v2431_v31 = vadd.f32 %v2369_v53, %v2197_v9  ;;  %v2150_v45 = vpop.f32.mrf.mxu0  ;;  %v2200_v53 = vadd.f32 %v2142_v59, %v1965_v60 }
 0x3b7   : > { %v2700_v48 = vadd.f32 %v4572_v32, %v2664_v10  ;;  %v2203_v21 = vadd.f32 %v2150_v45, %v4501_v57  ;;  %v3512_v57 = vld [vmem:[%s3825_s29] sm:$0xff] }
 0x3b8   : > { %3354 = vmatmul.msk.bf16.gmra.mxu1 %vm554_vm0, %v4468_v50  ;;  %v2248_v50 = vld [vmem:[#allocation2 + $0x1a1] sm:$0xff] }
 0x3b9   : > { %v2732_v52 = vmax.f32 %v2700_v48, 0.0  ;;  %3378 = vmatmul.msk.bf16.gmra.mxu2 %vm554_vm0, %v4470_v15  ;;  %v2264_v61 = vpack.c.bf16 %v2248_v50, %v2247_v12  ;;  %v2202_v50 = vadd.f32 %v2147_v51, %v1967_v16  ;;  %v4663_v51 = vld [vmem:[%s4846_s6] ss:$0 sm:$0xff] }
 0x3bb   : > { %v2758_v34 = vpack.c.bf16 %v2732_v52, %v2731_v42 }
 0x3bc   : > { %v2603_v22 = vpop.f32.mrf.mxu2 }
 0x3bd   : > { %3393 = vmatmul.msk.bf16.gmra.mxu3 %vm554_vm0, %v2758_v34  ;;  %v2371_v37 = vpop.f32.mrf.mxu1  ;;  %v2665_v40 = vadd.f32 %v2603_v22, %v2431_v31 }
 0x3be   : > { %v2432_v15 = vadd.f32 %v2371_v37, %v2198_v33  ;;  %v2152_v9 = vpop.f32.mrf.mxu0 }
 0x3bf   : > { %v2701_v28 = vadd.f32 %v4572_v32, %v2665_v40  ;;  %v2201_v40 = vadd.f32 %v2145_v20, %v4491_v47 }
 0x3c1   : > { %v2733_v13 = vmax.f32 %v2701_v28, 0.0 }
 0x3c4   : > { %v2605_v38 = vpop.f32.mrf.mxu2 }
 0x3c5   : > { %v2666_v44 = vadd.f32 %v2605_v38, %v2432_v15  ;;  %v2374_v6 = vpop.f32.mrf.mxu1 }
 0x3c6   : > { %v2433_v10 = vadd.f32 %v2374_v6, %v2199_v24  ;;  %v2155_v12 = vpop.f32.mrf.mxu0 }
 0x3c7   : > { %v2702_v11 = vadd.f32 %v4572_v32, %v2666_v44 }
 0x3c8   : > { %3355 = vmatmul.msk.bf16.gmra.mxu1 %vm554_vm0, %v2264_v61 }
 0x3c9   : > { %v2734_v8 = vmax.f32 %v2702_v11, 0.0  ;;  %3379 = vmatmul.msk.bf16.gmra.mxu2 %vm554_vm0, %v2498_v36  ;;  %v4656_v36 = vpop.f32.mrf.mxu3 }
 0x3cb   : > { %v2759_v27 = vpack.c.bf16 %v2734_v8, %v2733_v13  ;;  %v1969_v8 = vadd.f32 %v4506_v0, %v4504_v17 }
 0x3cc   : > { %v2608_v58 = vpop.f32.mrf.mxu2 }
 0x3cd   : > { %3394 = vmatmul.msk.bf16.gmra.mxu3 %vm554_vm0, %v2759_v27  ;;  %v2376_v62 = vpop.f32.mrf.mxu1  ;;  %v2667_v48 = vadd.f32 %v2608_v58, %v2433_v10  ;;  %v2204_v24 = vadd.f32 %v2152_v9, %v1969_v8 }
 0x3ce   : > { %v2434_v42 = vadd.f32 %v2376_v62, %v2200_v53  ;;  %v2157_v6 = vpop.f32.mrf.mxu0 }
 0x3cf   : > { %v2703_v34 = vadd.f32 %v4572_v32, %v2667_v48 }
 0x3d1   : > { %v2735_v31 = vmax.f32 %v2703_v34, 0.0 }
 0x3d4   : > { %v2610_v52 = vpop.f32.mrf.mxu2 }
 0x3d5   : > { %v2668_v22 = vadd.f32 %v2610_v52, %v2434_v42  ;;  %v2379_v37 = vpop.f32.mrf.mxu1 }
 0x3d6   : > { %v2435_v59 = vadd.f32 %v2379_v37, %v2201_v40  ;;  %v2160_v53 = vpop.f32.mrf.mxu0  ;;  %v2205_v40 = vadd.f32 %v2155_v12, %v4511_v49 }
 0x3d7   : > { %v2704_v56 = vadd.f32 %v4572_v32, %v2668_v22 }
 0x3d9   : > { %v2736_v5 = vmax.f32 %v2704_v56, 0.0 }
 0x3db   : > { %v2760_v25 = vpack.c.bf16 %v2736_v5, %v2735_v31  ;;  %v3513_v5 = vld [vmem:[%s3825_s29 + $0x8] sm:$0xff] }
 0x3dc   : > { %v2613_v33 = vpop.f32.mrf.mxu2 }
 0x3dd   : > { %3395 = vmatmul.msk.bf16.gmra.mxu3 %vm554_vm0, %v2760_v25  ;;  %v2381_v23 = vpop.f32.mrf.mxu1  ;;  %v2669_v19 = vadd.f32 %v2613_v33, %v2435_v59 }
 0x3de   : > { %v2436_v54 = vadd.f32 %v2381_v23, %v2202_v50  ;;  %v2162_v16 = vpop.f32.mrf.mxu0  ;;  %v1971_v50 = vadd.f32 %v4516_v39, %v4514_v2 }
 0x3df   : > { %v2705_v38 = vadd.f32 %v4572_v32, %v2669_v19 }
 0x3e1   : > { %v2737_v47 = vmax.f32 %v2705_v38, 0.0 }
 0x3e4   : > { %v2615_v15 = vpop.f32.mrf.mxu2 }
 0x3e5   : > { %v2670_v28 = vadd.f32 %v2615_v15, %v2436_v54  ;;  %v2384_v44 = vpop.f32.mrf.mxu1  ;;  %v2206_v15 = vadd.f32 %v2157_v6, %v1971_v50 }
 0x3e6   : > { %v2437_v27 = vadd.f32 %v2384_v44, %v2203_v21  ;;  %v2165_v39 = vpop.f32.mrf.mxu0 }
 0x3e7   : > { %v2706_v61 = vadd.f32 %v4572_v32, %v2670_v28 }
 0x3e9   : > { %v2738_v20 = vmax.f32 %v2706_v61, 0.0  ;;  %v3514_v61 = vld [vmem:[%s3825_s29 + $0x10] sm:$0xff] }
 0x3eb   : > { %v2761_v11 = vpack.c.bf16 %v2738_v20, %v2737_v47 }
 0x3ec   : > { %v2618_v55 = vpop.f32.mrf.mxu2 }
 0x3ed   : > { %3396 = vmatmul.msk.bf16.gmra.mxu3 %vm554_vm0, %v2761_v11  ;;  %v2386_v13 = vpop.f32.mrf.mxu1  ;;  %v2671_v62 = vadd.f32 %v2618_v55, %v2437_v27 }
 0x3ee   : > { %v2438_v10 = vadd.f32 %v2386_v13, %v2204_v24 }
 0x3ef   : > { %v2707_v42 = vadd.f32 %v4572_v32, %v2671_v62 }
 0x3f0   : > { %v2846_v58 = vpop.f32.mrf.mxu3 }
 0x3f1   : > { %v2847_v60 = vadd.f32 %v4663_v51, %v2846_v58  ;;  %v2739_v9 = vmax.f32 %v2707_v42, 0.0  ;;  %v3515_v58 = vld [vmem:[%s3825_s29 + $0x18] sm:$0xff] }
 0x3f3   : > { %v2926_v45 = vadd.f32 %v3512_v57, %v2847_v60  ;;  %v2207_v60 = vadd.f32 %v2160_v53, %v4521_v63 }
 0x3f4   : > { %v2620_v48 = vpop.f32.mrf.mxu2 }
 0x3f5   : > { %v2958_v52 = vmax.f32 %v2926_v45, 0.0  ;;  %v2672_v34 = vadd.f32 %v2620_v48, %v2438_v10  ;;  %v2389_v22 = vpop.f32.mrf.mxu1  ;;  %v1973_v45 = vadd.f32 %v4526_v18, %v4524_v14 }
 0x3f6   : > { %v2439_v19 = vadd.f32 %v2389_v22, %v2205_v40 }
 0x3f7   : > { %2990 = vst [vmem:[%s4672_s16] sm:$0xff] %v2958_v52  ;;  %v2708_v17 = vadd.f32 %v4572_v32, %v2672_v34  ;;  %v2208_v52 = vadd.f32 %v2162_v16, %v1973_v45  ;;  %v3517_v16 = vld [vmem:[%s3825_s29 + $0x28] sm:$0xff] }
 0x3f8   : > { %v2848_v0 = vpop.f32.mrf.mxu3 }
 0x3f9   : > { %v2740_v37 = vmax.f32 %v2708_v17, 0.0  ;;  %v2849_v56 = vadd.f32 %v4663_v51, %v2848_v0  ;;  %v2167_v17 = vpop.f32.mrf.mxu0 }
 0x3fb   : > { %v2762_v31 = vpack.c.bf16 %v2740_v37, %v2739_v9  ;;  %v2927_v25 = vadd.f32 %v3513_v5, %v2849_v56  ;;  %v3516_v9 = vld [vmem:[%s3825_s29 + $0x20] sm:$0xff] }
 0x3fc   : > { %v2623_v33 = vpop.f32.mrf.mxu2 }
 0x3fd   : > { %v2959_v23 = vmax.f32 %v2927_v25, 0.0  ;;  %3397 = vmatmul.msk.bf16.gmra.mxu3 %vm554_vm0, %v2762_v31  ;;  %v2391_v59 = vpop.f32.mrf.mxu1  ;;  %v2673_v38 = vadd.f32 %v2623_v33, %v2439_v19 }
 0x3fe   : > { %v2440_v44 = vadd.f32 %v2391_v59, %v2206_v15 }
 0x3ff   : > { %2991 = vst [vmem:[%s4672_s16 + $0x8] sm:$0xff] %v2959_v23  ;;  %v2709_v47 = vadd.f32 %v4572_v32, %v2673_v38 }
 0x400   : > { %v2851_v54 = vpop.f32.mrf.mxu3 }
 0x401   : > { %v2852_v28 = vadd.f32 %v4663_v51, %v2851_v54  ;;  %v2741_v6 = vmax.f32 %v2709_v47, 0.0  ;;  %v2170_v50 = vpop.f32.mrf.mxu0  ;;  %v2209_v54 = vadd.f32 %v2165_v39, %v4531_v3 }
 0x403   : > { %v2928_v49 = vadd.f32 %v3514_v61, %v2852_v28  ;;  %v1975_v28 = vadd.f32 %v4536_v29, %v4534_v35 }
 0x404   : > { %v2625_v12 = vpop.f32.mrf.mxu2 }
 0x405   : > { %v2960_v20 = vmax.f32 %v2928_v49, 0.0  ;;  %v2674_v11 = vadd.f32 %v2625_v12, %v2440_v44  ;;  %v2394_v55 = vpop.f32.mrf.mxu1  ;;  %v2210_v49 = vadd.f32 %v2167_v17, %v1975_v28 }
 0x406   : > { %v2441_v48 = vadd.f32 %v2394_v55, %v2207_v60 }
 0x407   : > { %2992 = vst [vmem:[%s4672_s16 + $0x10] sm:$0xff] %v2960_v20  ;;  %v2710_v2 = vadd.f32 %v4572_v32, %v2674_v11  ;;  %v3518_v11 = vld [vmem:[%s3825_s29 + $0x30] sm:$0xff] }
 0x408   : > { %v2853_v21 = vpop.f32.mrf.mxu3 }
 0x409   : > { %v2742_v13 = vmax.f32 %v2710_v2, 0.0  ;;  %v2854_v8 = vadd.f32 %v4663_v51, %v2853_v21 }
 0x40b   : > { %v2763_v27 = vpack.c.bf16 %v2742_v13, %v2741_v6  ;;  %v2929_v24 = vadd.f32 %v3515_v58, %v2854_v8  ;;  %v2172_v6 = vpop.f32.mrf.mxu0 }
 0x40c   : > { %v2628_v62 = vpop.f32.mrf.mxu2 }
 0x40d   : > { %v2961_v10 = vmax.f32 %v2929_v24, 0.0  ;;  %3398 = vmatmul.msk.bf16.gmra.mxu3 %vm554_vm0, %v2763_v27  ;;  %v2396_v57 = vpop.f32.mrf.mxu1  ;;  %v2675_v34 = vadd.f32 %v2628_v62, %v2441_v48  ;;  %v3519_v62 = vld [vmem:[%s3825_s29 + $0x38] sm:$0xff] }
 0x40e   : > { %v2442_v0 = vadd.f32 %v2396_v57, %v2208_v52  ;;  %v2211_v57 = vadd.f32 %v2170_v50, %v4541_v26 }
 0x40f   : > { %2993 = vst [vmem:[%s4672_s16 + $0x18] sm:$0xff] %v2961_v10  ;;  %v2711_v37 = vadd.f32 %v4572_v32, %v2675_v34 }
 0x410   : > { %v2856_v42 = vpop.f32.mrf.mxu3 }
 0x411   : > { %v2857_v22 = vadd.f32 %v4663_v51, %v2856_v42  ;;  %v2743_v25 = vmax.f32 %v2711_v37, 0.0  ;;  %v1977_v42 = vadd.f32 %v4546_v1, %v4544_v41 }
 0x413   : > { %v2930_v63 = vadd.f32 %v3516_v9, %v2857_v22  ;;  %v2175_v34 = vpop.f32.mrf.mxu0  ;;  %v2212_v17 = vadd.f32 %v2172_v6, %v1977_v42 }
 0x414   : > { %v2630_v53 = vpop.f32.mrf.mxu2 }
 0x415   : > { %v2962_v56 = vmax.f32 %v2930_v63, 0.0  ;;  %v2676_v31 = vadd.f32 %v2630_v53, %v2442_v0  ;;  %v2399_v5 = vpop.f32.mrf.mxu1  ;;  %v3520_v53 = vld [vmem:[%s3825_s29 + $0x40] sm:$0xff] }
 0x416   : > { %v2443_v44 = vadd.f32 %v2399_v5, %v2209_v54 }
 0x417   : > { %2994 = vst [vmem:[%s4672_s16 + $0x20] sm:$0xff] %v2962_v56  ;;  %v2712_v14 = vadd.f32 %v4572_v32, %v2676_v31 }
 0x418   : > { %v2858_v18 = vpop.f32.mrf.mxu3 }
 0x419   : > { %v2744_v33 = vmax.f32 %v2712_v14, 0.0  ;;  %v2859_v40 = vadd.f32 %v4663_v51, %v2858_v18 }
 0x41b   : > { %v2764_v23 = vpack.c.bf16 %v2744_v33, %v2743_v25  ;;  %v2931_v59 = vadd.f32 %v3517_v16, %v2859_v40  ;;  %v2177_v40 = vpop.f32.mrf.mxu0  ;;  %v3521_v16 = vld [vmem:[%s3825_s29 + $0x48] sm:$0xff] }
 0x41c   : > { %v2633_v19 = vpop.f32.mrf.mxu2 }
 0x41d   : > { %v2963_v15 = vmax.f32 %v2931_v59, 0.0  ;;  %3399 = vmatmul.msk.bf16.gmra.mxu3 %vm554_vm0, %v2764_v23  ;;  %v2401_v38 = vpop.f32.mrf.mxu1  ;;  %v2677_v12 = vadd.f32 %v2633_v19, %v2443_v44  ;;  %v2213_v19 = vadd.f32 %v2175_v34, %v4551_v30 }
 0x41e   : > { %v2444_v20 = vadd.f32 %v2401_v38, %v2210_v49  ;;  %v1979_v38 = vadd.f32 %v4556_v4, %v4554_v7 }
 0x41f   : > { %2995 = vst [vmem:[%s4672_s16 + $0x28] sm:$0xff] %v2963_v15  ;;  %v2713_v2 = vadd.f32 %v4572_v32, %v2677_v12 }
 0x420   : > { %v2861_v61 = vpop.f32.mrf.mxu3 }
 0x421   : > { %v2862_v47 = vadd.f32 %v4663_v51, %v2861_v61  ;;  %v2745_v8 = vmax.f32 %v2713_v2, 0.0  ;;  %v2214_v61 = vadd.f32 %v2177_v40, %v1979_v38 }
 0x423   : > { %v2932_v55 = vadd.f32 %v3518_v11, %v2862_v47  ;;  %v2180_v30 = vpop.f32.mrf.mxu0 }
 0x424   : > { %v2635_v3 = vpop.f32.mrf.mxu2 }
 0x425   : > { %v2964_v39 = vmax.f32 %v2932_v55, 0.0  ;;  %v2678_v21 = vadd.f32 %v2635_v3, %v2444_v20  ;;  %v2404_v13 = vpop.f32.mrf.mxu1  ;;  %v3522_v20 = vld [vmem:[%s3825_s29 + $0x50] sm:$0xff] }
 0x426   : > { %v2445_v52 = vadd.f32 %v2404_v13, %v2211_v57 }
 0x427   : > { %2996 = vst [vmem:[%s4672_s16 + $0x30] sm:$0xff] %v2964_v39  ;;  %v2714_v35 = vadd.f32 %v4572_v32, %v2678_v21 }
 0x428   : > { %v2863_v29 = vpop.f32.mrf.mxu3 }
 0x429   : > { %v2746_v27 = vmax.f32 %v2714_v35, 0.0  ;;  %v2864_v58 = vadd.f32 %v4663_v51, %v2863_v29 }
 0x42b   : > { %v2765_v24 = vpack.c.bf16 %v2746_v27, %v2745_v8  ;;  %v2933_v60 = vadd.f32 %v3519_v62, %v2864_v58  ;;  %v3523_v8 = vld [vmem:[%s3825_s29 + $0x58] sm:$0xff] }
 0x42c   : > { %v2638_v10 = vpop.f32.mrf.mxu2 }
 0x42d   : > { %v2965_v45 = vmax.f32 %v2933_v60, 0.0  ;;  %3400 = vmatmul.msk.bf16.gmra.mxu3 %vm554_vm0, %v2765_v24  ;;  %v2406_v48 = vpop.f32.mrf.mxu1  ;;  %v2679_v0 = vadd.f32 %v2638_v10, %v2445_v52  ;;  %v2215_v24 = vadd.f32 %v2180_v30, %v4561_v43  ;;  %v2182_v60 = vpop.f32.mrf.mxu0  ;;  %v1981_v10 = vadd.f32 %v4656_v36, %v4564_v46  ;;  %v3530_v30 = vld [vmem:[%s3825_s29 + $0x90] sm:$0xff] }
 0x42e   : > { %v2446_v63 = vadd.f32 %v2406_v48, %v2212_v17  ;;  %v3524_v17 = vld [vmem:[%s3825_s29 + $0x60] sm:$0xff] }
 0x42f   : > { %2997 = vst [vmem:[%s4672_s16 + $0x38] sm:$0xff] %v2965_v45  ;;  %v2715_v56 = vadd.f32 %v4572_v32, %v2679_v0  ;;  %v2216_v42 = vadd.f32 %v2182_v60, %v1981_v10 }
 0x430   : > { %v2866_v22 = vpop.f32.mrf.mxu3 }
 0x431   : > { %v2867_v9 = vadd.f32 %v4663_v51, %v2866_v22  ;;  %v2747_v18 = vmax.f32 %v2715_v56, 0.0 }
 0x433   : > { %v2934_v26 = vadd.f32 %v3520_v53, %v2867_v9 }
 0x434   : > { %v2640_v37 = vpop.f32.mrf.mxu2 }
 0x435   : > { %v2966_v31 = vmax.f32 %v2934_v26, 0.0  ;;  %v2680_v5 = vadd.f32 %v2640_v37, %v2446_v63  ;;  %v2409_v14 = vpop.f32.mrf.mxu1 }
 0x436   : > { %v2447_v28 = vadd.f32 %v2409_v14, %v2213_v19 }
 0x437   : > { %2998 = vst [vmem:[%s4672_s16 + $0x40] sm:$0xff] %v2966_v31  ;;  %v2716_v41 = vadd.f32 %v4572_v32, %v2680_v5  ;;  %v3525_v5 = vld [vmem:[%s3825_s29 + $0x68] sm:$0xff] }
 0x438   : > { %v2868_v1 = vpop.f32.mrf.mxu3 }
 0x439   : > { %v2748_v25 = vmax.f32 %v2716_v41, 0.0  ;;  %v2869_v33 = vadd.f32 %v4663_v51, %v2868_v1 }
 0x43b   : > { %v2766_v23 = vpack.c.bf16 %v2748_v25, %v2747_v18  ;;  %v2935_v59 = vadd.f32 %v3521_v16, %v2869_v33  ;;  %v3527_v16 = vld [vmem:[%s3825_s29 + $0x78] sm:$0xff] }
 0x43c   : > { %v2643_v50 = vpop.f32.mrf.mxu2 }
 0x43d   : > { %v2967_v54 = vmax.f32 %v2935_v59, 0.0  ;;  %3401 = vmatmul.msk.bf16.gmra.mxu3 %vm554_vm0, %v2766_v23  ;;  %v2411_v15 = vpop.f32.mrf.mxu1  ;;  %v2681_v49 = vadd.f32 %v2643_v50, %v2447_v28 }
 0x43e   : > { %v2448_v47 = vadd.f32 %v2411_v15, %v2214_v61  ;;  %v3528_v15 = vld [vmem:[%s3825_s29 + $0x80] sm:$0xff] }
 0x43f   : > { %2999 = vst [vmem:[%s4672_s16 + $0x48] sm:$0xff] %v2967_v54  ;;  %v2717_v3 = vadd.f32 %v4572_v32, %v2681_v49  ;;  %v3529_v49 = vld [vmem:[%s3825_s29 + $0x88] sm:$0xff] }
 0x440   : > { %v2871_v44 = vpop.f32.mrf.mxu3 }
 0x441   : > { %v2872_v12 = vadd.f32 %v4663_v51, %v2871_v44  ;;  %v2749_v6 = vmax.f32 %v2717_v3, 0.0 }
 0x443   : > { %v2936_v11 = vadd.f32 %v3522_v20, %v2872_v12 }
 0x444   : > { %v2645_v55 = vpop.f32.mrf.mxu2 }
 0x445   : > { %v2968_v2 = vmax.f32 %v2936_v11, 0.0  ;;  %v2682_v39 = vadd.f32 %v2645_v55, %v2448_v47  ;;  %v2414_v21 = vpop.f32.mrf.mxu1 }
 0x446   : > { %v2449_v57 = vadd.f32 %v2414_v21, %v2215_v24  ;;  %v3531_v21 = vld [vmem:[%s3825_s29 + $0x98] sm:$0xff]  ;;  %v3533_v24 = vld [vmem:[%s3825_s29 + $0xa8] sm:$0xff] }
 0x447   : > { %3000 = vst [vmem:[%s4672_s16 + $0x50] sm:$0xff] %v2968_v2  ;;  %v2718_v7 = vadd.f32 %v4572_v32, %v2682_v39 }
 0x448   : > { %v2873_v4 = vpop.f32.mrf.mxu3 }
 0x449   : > { %v2750_v13 = vmax.f32 %v2718_v7, 0.0  ;;  %v2874_v35 = vadd.f32 %v4663_v51, %v2873_v4 }
 0x44b   : > { %v2767_v29 = vpack.c.bf16 %v2750_v13, %v2749_v6  ;;  %v2937_v27 = vadd.f32 %v3523_v8, %v2874_v35  ;;  %v3532_v35 = vld [vmem:[%s3825_s29 + $0xa0] sm:$0xff] }
 0x44c   : > { %v2648_v58 = vpop.f32.mrf.mxu2 }
 0x44d   : > { %v2969_v62 = vmax.f32 %v2937_v27, 0.0  ;;  %3402 = vmatmul.msk.bf16.gmra.mxu3 %vm554_vm0, %v2767_v29  ;;  %v2416_v45 = vpop.f32.mrf.mxu1  ;;  %v2683_v52 = vadd.f32 %v2648_v58, %v2449_v57 }
 0x44e   : > { %v2450_v22 = vadd.f32 %v2416_v45, %v2216_v42  ;;  %v3534_v45 = vld [vmem:[%s3825_s29 + $0xb0] sm:$0xff] }
 0x44f   : > { %3001 = vst [vmem:[%s4672_s16 + $0x58] sm:$0xff] %v2969_v62  ;;  %v2719_v9 = vadd.f32 %v4572_v32, %v2683_v52 }
 0x450   : > { %v2876_v48 = vpop.f32.mrf.mxu3 }
 0x451   : > { %v2877_v34 = vadd.f32 %v4663_v51, %v2876_v48  ;;  %v2751_v26 = vmax.f32 %v2719_v9, 0.0 }
 0x453   : > { %v2938_v43 = vadd.f32 %v3524_v17, %v2877_v34 }
 0x454   : > { %v2650_v0 = vpop.f32.mrf.mxu2 }
 0x455   : > { %v2970_v63 = vmax.f32 %v2938_v43, 0.0  ;;  %v2684_v53 = vadd.f32 %v2650_v0, %v2450_v22  ;;  %v3535_v22 = vld [vmem:[%s3825_s29 + $0xb8] sm:$0xff] }
 0x457   : > { %3002 = vst [vmem:[%s4672_s16 + $0x60] sm:$0xff] %v2970_v63  ;;  %v2720_v46 = vadd.f32 %v4572_v32, %v2684_v53  ;;  %v3526_v32 = vld [vmem:[%s3825_s29 + $0x70] sm:$0xff]  ;;  %v3536_v63 = vld [vmem:[%s3825_s29 + $0xc0] sm:$0xff] }
 0x458   : > { %v2878_v36 = vpop.f32.mrf.mxu3 }
 0x459   : > { %v2752_v37 = vmax.f32 %v2720_v46, 0.0  ;;  %v2879_v56 = vadd.f32 %v4663_v51, %v2878_v36 }
 0x45b   : > { %v2768_v31 = vpack.c.bf16 %v2752_v37, %v2751_v26  ;;  %v2939_v14 = vadd.f32 %v3525_v5, %v2879_v56  ;;  %v3537_v37 = vld [vmem:[%s3825_s29 + $0xc8] sm:$0xff] }
 0x45d   : > { %v2971_v41 = vmax.f32 %v2939_v14, 0.0  ;;  %3403 = vmatmul.msk.bf16.gmra.mxu3 %vm554_vm0, %v2768_v31 }
 0x45f   : > { %3003 = vst [vmem:[%s4672_s16 + $0x68] sm:$0xff] %v2971_v41  ;;  %v3538_v41 = vld [vmem:[%s3825_s29 + $0xd0] sm:$0xff] }
 0x460   : > { %v2881_v1 = vpop.f32.mrf.mxu3 }
 0x461   : > { %v2882_v18 = vadd.f32 %v4663_v51, %v2881_v1 }
 0x463   : > { %v2940_v25 = vadd.f32 %v3526_v32, %v2882_v18 }
 0x465   : > { %v2972_v33 = vmax.f32 %v2940_v25, 0.0 }
 0x467   : > { %3004 = vst [vmem:[%s4672_s16 + $0x70] sm:$0xff] %v2972_v33  ;;  %v3539_v33 = vld [vmem:[%s3825_s29 + $0xd8] sm:$0xff] }
 0x468   : > { %v2883_v40 = vpop.f32.mrf.mxu3 }
 0x469   : > { %v2884_v23 = vadd.f32 %v4663_v51, %v2883_v40 }
 0x46b   : > { %v2941_v59 = vadd.f32 %v3527_v16, %v2884_v23 }
 0x46d   : > { %v2973_v50 = vmax.f32 %v2941_v59, 0.0 }
 0x46f   : > { %3005 = vst [vmem:[%s4672_s16 + $0x78] sm:$0xff] %v2973_v50  ;;  %v3540_v50 = vld [vmem:[%s3825_s29 + $0xe0] sm:$0xff] }
 0x470   : > { %v2886_v19 = vpop.f32.mrf.mxu3 }
 0x471   : > { %v2887_v54 = vadd.f32 %v4663_v51, %v2886_v19 }
 0x473   : > { %v2942_v38 = vadd.f32 %v3528_v15, %v2887_v54 }
 0x475   : > { %v2974_v28 = vmax.f32 %v2942_v38, 0.0 }
 0x477   : > { %3006 = vst [vmem:[%s4672_s16 + $0x80] sm:$0xff] %v2974_v28  ;;  %v3541_v28 = vld [vmem:[%s3825_s29 + $0xe8] sm:$0xff] }
 0x478   : > { %v2888_v44 = vpop.f32.mrf.mxu3 }
 0x479   : > { %v2889_v61 = vadd.f32 %v4663_v51, %v2888_v44 }
 0x47b   : > { %v2943_v12 = vadd.f32 %v3529_v49, %v2889_v61 }
 0x47d   : > { %v2975_v47 = vmax.f32 %v2943_v12, 0.0 }
 0x47f   : > { %3007 = vst [vmem:[%s4672_s16 + $0x88] sm:$0xff] %v2975_v47  ;;  %v3542_v47 = vld [vmem:[%s3825_s29 + $0xf0] sm:$0xff] }
 0x480   : > { %v2891_v20 = vpop.f32.mrf.mxu3 }
 0x481   : > { %v2892_v11 = vadd.f32 %v4663_v51, %v2891_v20 }
 0x483   : > { %v2944_v55 = vadd.f32 %v3530_v30, %v2892_v11 }
 0x485   : > { %v2976_v3 = vmax.f32 %v2944_v55, 0.0 }
 0x487   : > { %3008 = vst [vmem:[%s4672_s16 + $0x90] sm:$0xff] %v2976_v3  ;;  %v3543_v3 = vld [vmem:[%s3825_s29 + $0xf8] sm:$0xff] }
 0x488   : > { %v2893_v2 = vpop.f32.mrf.mxu3 }
 0x489   : > { %v2894_v39 = vadd.f32 %v4663_v51, %v2893_v2 }
 0x48b   : > { %v2945_v7 = vadd.f32 %v3531_v21, %v2894_v39 }
 0x48d   : > { %v2977_v4 = vmax.f32 %v2945_v7, 0.0 }
 0x48f   : > { %3009 = vst [vmem:[%s4672_s16 + $0x98] sm:$0xff] %v2977_v4 }
 0x490   : > { %v2896_v6 = vpop.f32.mrf.mxu3 }
 0x491   : > { %v2897_v13 = vadd.f32 %v4663_v51, %v2896_v6 }
 0x493   : > { %v2946_v29 = vadd.f32 %v3532_v35, %v2897_v13 }
 0x495   : > { %v2978_v8 = vmax.f32 %v2946_v29, 0.0 }
 0x497   : > { %3010 = vst [vmem:[%s4672_s16 + $0xa0] sm:$0xff] %v2978_v8 }
 0x498   : > { %v2898_v27 = vpop.f32.mrf.mxu3 }
 0x499   : > { %v2899_v58 = vadd.f32 %v4663_v51, %v2898_v27 }
 0x49b   : > { %v2947_v62 = vadd.f32 %v3533_v24, %v2899_v58 }
 0x49d   : > { %v2979_v60 = vmax.f32 %v2947_v62, 0.0 }
 0x49f   : > { %3011 = vst [vmem:[%s4672_s16 + $0xa8] sm:$0xff] %v2979_v60 }
 0x4a0   : > { %v2901_v10 = vpop.f32.mrf.mxu3 }
 0x4a1   : > { %v2902_v57 = vadd.f32 %v4663_v51, %v2901_v10 }
 0x4a3   : > { %v2948_v48 = vadd.f32 %v3534_v45, %v2902_v57 }
 0x4a5   : > { %v2980_v42 = vmax.f32 %v2948_v48, 0.0 }
 0x4a7   : > { %3012 = vst [vmem:[%s4672_s16 + $0xb0] sm:$0xff] %v2980_v42 }
 0x4a8   : > { %v2903_v52 = vpop.f32.mrf.mxu3 }
 0x4a9   : > { %v2904_v34 = vadd.f32 %v4663_v51, %v2903_v52 }
 0x4ab   : > { %v2949_v17 = vadd.f32 %v3535_v22, %v2904_v34 }
 0x4ad   : > { %v2981_v43 = vmax.f32 %v2949_v17, 0.0 }
 0x4af   : > { %3013 = vst [vmem:[%s4672_s16 + $0xb8] sm:$0xff] %v2981_v43 }
 0x4b0   : > { %v2906_v0 = vpop.f32.mrf.mxu3 }
 0x4b1   : > { %v2907_v9 = vadd.f32 %v4663_v51, %v2906_v0 }
 0x4b3   : > { %v2950_v53 = vadd.f32 %v3536_v63, %v2907_v9 }
 0x4b5   : > { %v2982_v46 = vmax.f32 %v2950_v53, 0.0 }
 0x4b7   : > { %3014 = vst [vmem:[%s4672_s16 + $0xc0] sm:$0xff] %v2982_v46 }
 0x4b8   : > { %v2908_v36 = vpop.f32.mrf.mxu3 }
 0x4b9   : > { %v2909_v26 = vadd.f32 %v4663_v51, %v2908_v36 }
 0x4bb   : > { %v2951_v56 = vadd.f32 %v3537_v37, %v2909_v26 }
 0x4bd   : > { %v2983_v31 = vmax.f32 %v2951_v56, 0.0 }
 0x4bf   : > { %3015 = vst [vmem:[%s4672_s16 + $0xc8] sm:$0xff] %v2983_v31 }
 0x4c0   : > { %v2911_v5 = vpop.f32.mrf.mxu3 }
 0x4c1   : > { %v2912_v14 = vadd.f32 %v4663_v51, %v2911_v5 }
 0x4c3   : > { %v2952_v1 = vadd.f32 %v3538_v41, %v2912_v14 }
 0x4c5   : > { %v2984_v18 = vmax.f32 %v2952_v1, 0.0 }
 0x4c7   : > { %3016 = vst [vmem:[%s4672_s16 + $0xd0] sm:$0xff] %v2984_v18 }
 0x4c8   : > { %v2913_v32 = vpop.f32.mrf.mxu3 }
 0x4c9   : > { %v2914_v25 = vadd.f32 %v4663_v51, %v2913_v32 }
 0x4cb   : > { %v2953_v40 = vadd.f32 %v3539_v33, %v2914_v25 }
 0x4cd   : > { %v2985_v23 = vmax.f32 %v2953_v40, 0.0 }
 0x4cf   : > { %3017 = vst [vmem:[%s4672_s16 + $0xd8] sm:$0xff] %v2985_v23 }
 0x4d0   : > { %v2916_v16 = vpop.f32.mrf.mxu3 }
 0x4d1   : > { %v2917_v59 = vadd.f32 %v4663_v51, %v2916_v16 }
 0x4d3   : > { %v2954_v19 = vadd.f32 %v3540_v50, %v2917_v59 }
 0x4d5   : > { %v2986_v54 = vmax.f32 %v2954_v19, 0.0 }
 0x4d7   : > { %3018 = vst [vmem:[%s4672_s16 + $0xe0] sm:$0xff] %v2986_v54 }
 0x4d8   : > { %v2918_v15 = vpop.f32.mrf.mxu3 }
 0x4d9   : > { %v2919_v38 = vadd.f32 %v4663_v51, %v2918_v15 }
 0x4db   : > { %v2955_v44 = vadd.f32 %v3541_v28, %v2919_v38 }
 0x4dd   : > { %v2987_v61 = vmax.f32 %v2955_v44, 0.0 }
 0x4df   : > { %3019 = vst [vmem:[%s4672_s16 + $0xe8] sm:$0xff] %v2987_v61 }
 0x4e0   : > { %v2921_v49 = vpop.f32.mrf.mxu3 }
 0x4e1   : > { %v2922_v12 = vadd.f32 %v4663_v51, %v2921_v49 }
 0x4e3   : > { %v2956_v20 = vadd.f32 %v3542_v47, %v2922_v12 }
 0x4e5   : > { %v2988_v11 = vmax.f32 %v2956_v20, 0.0 }
 0x4e7   : > { %3020 = vst [vmem:[%s4672_s16 + $0xf0] sm:$0xff] %v2988_v11 }
 0x4e8   : > { %v2923_v30 = vpop.f32.mrf.mxu3 }
 0x4e9   : > { %v2924_v55 = vadd.f32 %v4663_v51, %v2923_v30 }
 0x4eb   : > { %v2957_v2 = vadd.f32 %v3543_v3, %v2924_v55 }
 0x4ed   : > { %v2989_v39 = vmax.f32 %v2957_v2, 0.0 }
 0x4ef   : > { %3021 = vst [vmem:[%s4672_s16 + $0xf8] sm:$0xff] %v2989_v39 }
 0x4f0   : > { %3631 = shalt.err (!%p3628_p10)
}
 0x4f1   : > { %s3682_s23 = smov 128   ;;  %s3683_s29 = smov 8  }
 0x4f2   : > { %3451 = dma.vmem_to_hbm [thread:$0]  (%p3791_p7), %s3036_s9, 4096, %s3038_s10, %s3023_s11, %s3682_s23, %s3682_s23, %s3683_s29  }
 0x4f3 PF: > { %s3052_s16 = sand.u32 1, %s3662_s24   ;;  %p4872_p12 = scmp.ge.s32.totalorder %s3674_s27, 2 }
 0x4f4   : > { %s3053_s17 = scalar_lea.sflag [#allocation5], %s3052_s16 }
 0x4f5   : > { %p3462_p13 = pnand %p4872_p12, %p3759_p6 }
 0x4f7   : > { %p3463_p0 = pneg %p3462_p13 }
 0x4f9   : > { %3657 = dma.done.wait (%p3463_p0), %s3053_s17, 4096  }
 0x4fa   : > { %3659 = vsyncadd (%p3463_p0), %s3053_s17, 4294963200  ;;  %p21_p3 = scmp.ge.s32.totalorder %s3777_s15, 4   ;;  %s4873_s24 = smov %s3666_s25 }
 0x4fb   : > { %s4874_s25 = smov %s3670_s26  ;;  %s4875_s26 = smov %s3787_s20 }
 0x4fc   : > { %s4876_s27 = smov %s3777_s15  ;;  %23 = sbr.rel (!%p21_p3) target bundleno = 8 (0x8), region = 107 }
 0x501   :  { %3059 = vsyncpa [#allocation4], 1 }
 0x502   :  { %3061 = vsyncpa [#allocation4 + $0x1], 1 }
 0x503   :  { %3062 = vsyncpa [#allocation7], 1 }
 0x504   :  { %3063 = vsyncpa [#allocation5], 1 }
 0x505   :  { %3065 = vsyncpa [#allocation5 + $0x1], 1 }

</bundles_post_ra>
